<compile_context>
chip_gen: v7x
topology: tpu7x:2x2x1
jax: 0.10.0
libtpu: 0.0.40
codegen_flags: <defaults>
</compile_context>

<pallas_src>
import functools
import math

import jax
import jax.numpy as jnp
from jax.experimental import pallas as pl
from jax.experimental.pallas import tpu as pltpu

# ----------------------------- model config (small) -----------------------------
BATCH = 2
SEQ = 8
HIDDEN = 32
NUM_HEADS = 4
HEAD_DIM = HIDDEN // NUM_HEADS
INTERMEDIATE = 64
NUM_LAYERS = 2
VOCAB = 50
MAX_POS = 16
TYPE_VOCAB = 2
NUM_CLASSES = 4
LN_EPS = 1e-12

N_TOK = BATCH * SEQ
ATTN_SCALE = 1.0 / math.sqrt(HEAD_DIM)
LOG2_SEQ = SEQ.bit_length() - 1
assert SEQ == (1 << LOG2_SEQ), "SEQ must be a power of two for the shift-based batch id"

# Everything is tiny: single grid point, whole arrays VMEM-resident.
VMEM_SPEC = pl.BlockSpec(memory_space=pltpu.MemorySpace.VMEM)


# ------------------------------ in-kernel helpers --------------------------------
def _mm(a, b):
    """MXU matmul: bf16 operands, fp32 accumulation."""
    return jnp.dot(a.astype(jnp.bfloat16), b.astype(jnp.bfloat16),
                   preferred_element_type=jnp.float32)


def _mm_nt(a, b):
    """a @ b.T (contract last dims of both) without materializing a transpose."""
    return jax.lax.dot_general(
        a.astype(jnp.bfloat16), b.astype(jnp.bfloat16),
        (((1,), (1,)), ((), ())), preferred_element_type=jnp.float32)


def _layernorm(x, g, b):
    mean = jnp.mean(x, axis=-1, keepdims=True)
    xc = x - mean
    var = jnp.mean(xc * xc, axis=-1, keepdims=True)
    return xc * jax.lax.rsqrt(var + LN_EPS) * g + b


def _gelu(x):
    # TODO(synk): HF/PyTorch BertModel uses exact erf GELU; tanh approximation kept here
    # (erf has no guaranteed Mosaic lowering; difference is ~1e-3 relative).
    return 0.5 * x * (1.0 + jnp.tanh(0.7978845608028654 * (x + 0.044715 * x * x * x)))


# ------------------------------- fused forward kernel ------------------------------
def bert_fused_kernel(ids_ref, mask_ref,
                      word_emb_ref, pos_emb_ref, type_emb_ref,
                      emb_g_ref, emb_b_ref,
                      wqkv_ref, bqkv_ref, wo_ref, bo_ref,
                      ln1_g_ref, ln1_b_ref,
                      w1_ref, b1_ref, w2_ref, b2_ref,
                      ln2_g_ref, ln2_b_ref,
                      pool_w_ref, pool_b_ref, fc_w_ref, fc_b_ref,
                      out_ref):
    f32 = jnp.float32

    # ---- embeddings: one-hot token gather on the MXU + pos + type, then LN ------
    ids = ids_ref[...]                                              # (N_TOK, 1) int32
    vocab_iota = jax.lax.broadcasted_iota(jnp.int32, (N_TOK, VOCAB), 1)
    tok_onehot = (vocab_iota == ids).astype(f32)                    # (N_TOK, VOCAB)
    emb = _mm(tok_onehot, word_emb_ref[...])                        # (N_TOK, HIDDEN)

    pos_rows = pos_emb_ref[0:SEQ, :]                                # (SEQ, HIDDEN)
    emb = emb + jnp.concatenate([pos_rows] * BATCH, axis=0)         # per-batch positions
    emb = emb + type_emb_ref[0:1, :]                                # token_type_ids == 0

    h = _layernorm(emb, emb_g_ref[...], emb_b_ref[...])             # (N_TOK, HIDDEN)

    # ---- attention bias: same-batch block-diagonal AND key-not-padded -----------
    mask = mask_ref[...]                                            # (1, N_TOK) float
    row_b = jax.lax.broadcasted_iota(jnp.int32, (N_TOK, N_TOK), 0) >> LOG2_SEQ
    col_b = jax.lax.broadcasted_iota(jnp.int32, (N_TOK, N_TOK), 1) >> LOG2_SEQ
    valid = jnp.logical_and(row_b == col_b, mask > 0.5)             # key mask bcast on rows
    bias = jnp.where(valid, 0.0, -10000.0)                          # BERT -10000 convention

    # ---- encoder layers (static unroll) ------------------------------------------
    for l in range(NUM_LAYERS):
        qkv = _mm(h, wqkv_ref[l]) + bqkv_ref[l]                     # (N_TOK, 3*HIDDEN)

        ctx_heads = []
        for hh in range(NUM_HEADS):
            lo = hh * HEAD_DIM
            q_h = qkv[:, lo:lo + HEAD_DIM]                          # (N_TOK, HEAD_DIM)
            k_h = qkv[:, HIDDEN + lo:HIDDEN + lo + HEAD_DIM]
            v_h = qkv[:, 2 * HIDDEN + lo:2 * HIDDEN + lo + HEAD_DIM]
            s = _mm_nt(q_h, k_h) * ATTN_SCALE + bias                # (N_TOK, N_TOK)
            m = jnp.max(s, axis=-1, keepdims=True)
            e = jnp.exp(s - m)
            denom = jnp.sum(e, axis=-1, keepdims=True)
            p = e * pl.reciprocal(denom, approx=True)               # EUP reciprocal
            ctx_heads.append(_mm(p, v_h))                           # (N_TOK, HEAD_DIM)
        ctx = jnp.concatenate(ctx_heads, axis=1)                    # (N_TOK, HIDDEN)

        attn_out = _mm(ctx, wo_ref[l]) + bo_ref[l]
        h = _layernorm(attn_out + h, ln1_g_ref[l], ln1_b_ref[l])

        ff = _gelu(_mm(h, w1_ref[l]) + b1_ref[l])                   # (N_TOK, INTERMEDIATE)
        ff = _mm(ff, w2_ref[l]) + b2_ref[l]
        h = _layernorm(ff + h, ln2_g_ref[l], ln2_b_ref[l])

    # ---- pooler (CLS rows) + classifier + softmax --------------------------------
    cls = jnp.concatenate([h[b * SEQ:b * SEQ + 1, :] for b in range(BATCH)], axis=0)
    pooled = jnp.tanh(_mm(cls, pool_w_ref[...]) + pool_b_ref[...])  # (BATCH, HIDDEN)
    logits = _mm(pooled, fc_w_ref[...]) + fc_b_ref[...]             # (BATCH, NUM_CLASSES)
    m = jnp.max(logits, axis=-1, keepdims=True)
    e = jnp.exp(logits - m)
    out_ref[...] = e / jnp.sum(e, axis=-1, keepdims=True)           # exact div (sum-to-1)


# ------------------------------- parameter init -----------------------------------
def init_params(key):
    std = 0.02
    keys = iter(jax.random.split(key, 128))

    def dense(fan_in, fan_out):
        return (jax.random.normal(next(keys), (fan_in, fan_out), jnp.float32) * std,
                jnp.zeros((fan_out,), jnp.float32))

    params = {
        "word_emb": jax.random.normal(next(keys), (VOCAB, HIDDEN), jnp.float32) * std,
        "pos_emb": jax.random.normal(next(keys), (MAX_POS, HIDDEN), jnp.float32) * std,
        "type_emb": jax.random.normal(next(keys), (TYPE_VOCAB, HIDDEN), jnp.float32) * std,
        "emb_ln_g": jnp.ones((1, HIDDEN), jnp.float32),
        "emb_ln_b": jnp.zeros((1, HIDDEN), jnp.float32),
    }

    wqkv, bqkv, wo, bo = [], [], [], []
    w1, b1, w2, b2 = [], [], [], []
    ln1g, ln1b, ln2g, ln2b = [], [], [], []
    for _ in range(NUM_LAYERS):
        wq, bq = dense(HIDDEN, HIDDEN)
        wk, bk = dense(HIDDEN, HIDDEN)
        wv, bv = dense(HIDDEN, HIDDEN)
        wqkv.append(jnp.concatenate([wq, wk, wv], axis=1))               # (H, 3H)
        bqkv.append(jnp.concatenate([bq, bk, bv]).reshape(1, 3 * HIDDEN))
        w, b = dense(HIDDEN, HIDDEN)
        wo.append(w); bo.append(b.reshape(1, HIDDEN))
        w, b = dense(HIDDEN, INTERMEDIATE)
        w1.append(w); b1.append(b.reshape(1, INTERMEDIATE))
        w, b = dense(INTERMEDIATE, HIDDEN)
        w2.append(w); b2.append(b.reshape(1, HIDDEN))
        ln1g.append(jnp.ones((1, HIDDEN), jnp.float32))
        ln1b.append(jnp.zeros((1, HIDDEN), jnp.float32))
        ln2g.append(jnp.ones((1, HIDDEN), jnp.float32))
        ln2b.append(jnp.zeros((1, HIDDEN), jnp.float32))

    stack = lambda xs: jnp.stack(xs, axis=0)
    params.update(
        wqkv=stack(wqkv), bqkv=stack(bqkv), wo=stack(wo), bo=stack(bo),
        w1=stack(w1), b1=stack(b1), w2=stack(w2), b2=stack(b2),
        ln1_g=stack(ln1g), ln1_b=stack(ln1b), ln2_g=stack(ln2g), ln2_b=stack(ln2b))

    pw, pb = dense(HIDDEN, HIDDEN)
    params["pool_w"], params["pool_b"] = pw, pb.reshape(1, HIDDEN)
    fw, fb = dense(HIDDEN, NUM_CLASSES)
    params["fc_w"], params["fc_b"] = fw, fb.reshape(1, NUM_CLASSES)
    return params


# --------------------------------- forward pass -----------------------------------
def model_forward(params, context, mask):
    # TODO(synk): token_type_ids (x[1]) ignored, matching the module's bert(context, mask)
    # call which defaults them to zeros; kernel always adds type_emb[0].
    B, S = context.shape
    ids2d = context.reshape(B * S, 1).astype(jnp.int32)
    maskf = mask.reshape(1, B * S).astype(jnp.float32)
    return pl.pallas_call(
        bert_fused_kernel,
        out_shape=jax.ShapeDtypeStruct((B, NUM_CLASSES), jnp.float32),
        in_specs=[VMEM_SPEC] * 23,
        out_specs=VMEM_SPEC,
    )(ids2d, maskf,
      params["word_emb"], params["pos_emb"], params["type_emb"],
      params["emb_ln_g"], params["emb_ln_b"],
      params["wqkv"], params["bqkv"], params["wo"], params["bo"],
      params["ln1_g"], params["ln1_b"],
      params["w1"], params["b1"], params["w2"], params["b2"],
      params["ln2_g"], params["ln2_b"],
      params["pool_w"], params["pool_b"], params["fc_w"], params["fc_b"])


# ------------------------------------- main ---------------------------------------
if __name__ == "__main__":
    key = jax.random.PRNGKey(0)
    k_param, k_tok = jax.random.split(key)

    params = init_params(k_param)

    context = jax.random.randint(k_tok, (BATCH, SEQ), 0, VOCAB, dtype=jnp.int32)
    segment = jnp.zeros((BATCH, SEQ), jnp.int32)          # x[1]; unused by forward
    mask = jnp.ones((BATCH, SEQ), jnp.int32).at[1, 6:].set(0)
    x = (context, segment, mask)

    fwd = jax.jit(model_forward)
    out = fwd(params, x[0], x[2])
    out = jax.block_until_ready(out)

    assert out.shape == (BATCH, NUM_CLASSES)
    assert bool(jnp.all(jnp.abs(jnp.sum(out, axis=-1) - 1.0) < 1e-4))
    print("KERNEL_OK")
</pallas_src>

<mosaic_0001>
module attributes {stable_mosaic.version = 11 : i64} {
  func.func @bert_fused_kernel(%arg0: memref<16x1xi32, #tpu.memory_space<vmem>>, %arg1: memref<1x16xf32, #tpu.memory_space<vmem>>, %arg2: memref<50x32xf32, #tpu.memory_space<vmem>>, %arg3: memref<16x32xf32, #tpu.memory_space<vmem>>, %arg4: memref<2x32xf32, #tpu.memory_space<vmem>>, %arg5: memref<1x32xf32, #tpu.memory_space<vmem>>, %arg6: memref<1x32xf32, #tpu.memory_space<vmem>>, %arg7: memref<2x32x96xf32, #tpu.memory_space<vmem>>, %arg8: memref<2x1x96xf32, #tpu.memory_space<vmem>>, %arg9: memref<2x32x32xf32, #tpu.memory_space<vmem>>, %arg10: memref<2x1x32xf32, #tpu.memory_space<vmem>>, %arg11: memref<2x1x32xf32, #tpu.memory_space<vmem>>, %arg12: memref<2x1x32xf32, #tpu.memory_space<vmem>>, %arg13: memref<2x32x64xf32, #tpu.memory_space<vmem>>, %arg14: memref<2x1x64xf32, #tpu.memory_space<vmem>>, %arg15: memref<2x64x32xf32, #tpu.memory_space<vmem>>, %arg16: memref<2x1x32xf32, #tpu.memory_space<vmem>>, %arg17: memref<2x1x32xf32, #tpu.memory_space<vmem>>, %arg18: memref<2x1x32xf32, #tpu.memory_space<vmem>>, %arg19: memref<32x32xf32, #tpu.memory_space<vmem>>, %arg20: memref<1x32xf32, #tpu.memory_space<vmem>>, %arg21: memref<32x4xf32, #tpu.memory_space<vmem>>, %arg22: memref<1x4xf32, #tpu.memory_space<vmem>>, %arg23: memref<2x4xf32, #tpu.memory_space<vmem>>) attributes {dimension_semantics = [], scalar_prefetch = 0 : i64, scratch_operands = 0 : i64, tpu.core_type = #tpu.core_type<tc>} {
    %c0 = arith.constant 0 : index
    %c0_0 = arith.constant 0 : index
    %0 = vector.load %arg0[%c0, %c0_0] : memref<16x1xi32, #tpu.memory_space<vmem>>, vector<16x1xi32>
    %1 = tpu.iota {dimensions = array<i32: 1>} : vector<16x50xi32>
    %2 = vector.broadcast %0 : vector<16x1xi32> to vector<16x50xi32>
    %3 = arith.cmpi eq, %1, %2 : vector<16x50xi32>
    %4 = arith.extui %3 : vector<16x50xi1> to vector<16x50xi32>
    %5 = arith.sitofp %4 : vector<16x50xi32> to vector<16x50xf32>
    %c0_1 = arith.constant 0 : index
    %c0_2 = arith.constant 0 : index
    %6 = vector.load %arg2[%c0_1, %c0_2] : memref<50x32xf32, #tpu.memory_space<vmem>>, vector<50x32xf32>
    %7 = arith.truncf %5 : vector<16x50xf32> to vector<16x50xbf16>
    %8 = arith.truncf %6 : vector<50x32xf32> to vector<50x32xbf16>
    %cst = arith.constant dense<0.000000e+00> : vector<16x32xf32>
    %9 = tpu.matmul %7, %8, %cst {dimension_numbers = #tpu.dot_dimension_numbers<[1], [0], [0], [1], [0, 0, 1, 1], [], []>} : vector<16x50xbf16>, vector<50x32xbf16>, vector<16x32xf32> -> vector<16x32xf32>
    %c0_3 = arith.constant 0 : index
    %c0_4 = arith.constant 0 : index
    %10 = vector.load %arg3[%c0_3, %c0_4] : memref<16x32xf32, #tpu.memory_space<vmem>>, vector<8x32xf32>
    %11 = tpu.concatenate %10, %10 in 0 : vector<8x32xf32>, vector<8x32xf32> -> vector<16x32xf32>
    %12 = arith.addf %9, %11 : vector<16x32xf32>
    %c0_5 = arith.constant 0 : index
    %c0_6 = arith.constant 0 : index
    %13 = vector.load %arg4[%c0_5, %c0_6] : memref<2x32xf32, #tpu.memory_space<vmem>>, vector<1x32xf32>
    %14 = vector.broadcast %13 : vector<1x32xf32> to vector<16x32xf32>
    %15 = arith.addf %12, %14 : vector<16x32xf32>
    %c0_7 = arith.constant 0 : index
    %c0_8 = arith.constant 0 : index
    %16 = vector.load %arg5[%c0_7, %c0_8] : memref<1x32xf32, #tpu.memory_space<vmem>>, vector<1x32xf32>
    %c0_9 = arith.constant 0 : index
    %c0_10 = arith.constant 0 : index
    %17 = vector.load %arg6[%c0_9, %c0_10] : memref<1x32xf32, #tpu.memory_space<vmem>>, vector<1x32xf32>
    %cst_11 = arith.constant dense<0.000000e+00> : vector<16xf32>
    %18 = vector.multi_reduction <add>, %15, %cst_11 [1] : vector<16x32xf32> to vector<16xf32>
    %19 = vector.shape_cast %18 : vector<16xf32> to vector<16x1xf32>
    %cst_12 = arith.constant 3.200000e+01 : f32
    %20 = vector.broadcast %cst_12 : f32 to vector<16x1xf32>
    %21 = arith.divf %19, %20 : vector<16x1xf32>
    %22 = vector.broadcast %21 : vector<16x1xf32> to vector<16x32xf32>
    %23 = arith.subf %15, %22 : vector<16x32xf32>
    %24 = arith.mulf %23, %23 : vector<16x32xf32>
    %cst_13 = arith.constant dense<0.000000e+00> : vector<16xf32>
    %25 = vector.multi_reduction <add>, %24, %cst_13 [1] : vector<16x32xf32> to vector<16xf32>
    %26 = vector.shape_cast %25 : vector<16xf32> to vector<16x1xf32>
    %cst_14 = arith.constant 3.200000e+01 : f32
    %27 = vector.broadcast %cst_14 : f32 to vector<16x1xf32>
    %28 = arith.divf %26, %27 : vector<16x1xf32>
    %cst_15 = arith.constant 9.99999996E-13 : f32
    %29 = vector.broadcast %cst_15 : f32 to vector<16x1xf32>
    %30 = arith.addf %28, %29 : vector<16x1xf32>
    %31 = math.rsqrt %30 : vector<16x1xf32>
    %32 = vector.broadcast %31 : vector<16x1xf32> to vector<16x32xf32>
    %33 = arith.mulf %23, %32 : vector<16x32xf32>
    %34 = vector.broadcast %16 : vector<1x32xf32> to vector<16x32xf32>
    %35 = arith.mulf %33, %34 : vector<16x32xf32>
    %36 = vector.broadcast %17 : vector<1x32xf32> to vector<16x32xf32>
    %37 = arith.addf %35, %36 : vector<16x32xf32>
    %c0_16 = arith.constant 0 : index
    %c0_17 = arith.constant 0 : index
    %38 = vector.load %arg1[%c0_16, %c0_17] : memref<1x16xf32, #tpu.memory_space<vmem>>, vector<1x16xf32>
    %39 = tpu.iota {dimensions = array<i32: 0>} : vector<16x16xi32>
    %c3_i32 = arith.constant 3 : i32
    %40 = vector.broadcast %c3_i32 : i32 to vector<16x16xi32>
    %41 = arith.shrsi %39, %40 : vector<16x16xi32>
    %42 = tpu.iota {dimensions = array<i32: 1>} : vector<16x16xi32>
    %c3_i32_18 = arith.constant 3 : i32
    %43 = vector.broadcast %c3_i32_18 : i32 to vector<16x16xi32>
    %44 = arith.shrsi %42, %43 : vector<16x16xi32>
    %45 = arith.cmpi eq, %41, %44 : vector<16x16xi32>
    %cst_19 = arith.constant 5.000000e-01 : f32
    %46 = vector.broadcast %cst_19 : f32 to vector<1x16xf32>
    %47 = arith.cmpf ogt, %38, %46 : vector<1x16xf32>
    %48 = vector.broadcast %47 : vector<1x16xi1> to vector<16x16xi1>
    %49 = arith.andi %45, %48 : vector<16x16xi1>
    %cst_20 = arith.constant 0.000000e+00 : f32
    %cst_21 = arith.constant -1.000000e+04 : f32
    %50 = vector.broadcast %cst_20 : f32 to vector<16x16xf32>
    %51 = vector.broadcast %cst_21 : f32 to vector<16x16xf32>
    %52 = arith.select %49, %50, %51 : vector<16x16xi1>, vector<16x16xf32>
    %c0_22 = arith.constant 0 : index
    %c0_23 = arith.constant 0 : index
    %c0_24 = arith.constant 0 : index
    %53 = vector.load %arg7[%c0_22, %c0_23, %c0_24] : memref<2x32x96xf32, #tpu.memory_space<vmem>>, vector<1x32x96xf32>
    %54 = vector.shape_cast %53 : vector<1x32x96xf32> to vector<32x96xf32>
    %55 = arith.truncf %37 : vector<16x32xf32> to vector<16x32xbf16>
    %56 = arith.truncf %54 : vector<32x96xf32> to vector<32x96xbf16>
    %cst_25 = arith.constant dense<0.000000e+00> : vector<16x96xf32>
    %57 = tpu.matmul %55, %56, %cst_25 {dimension_numbers = #tpu.dot_dimension_numbers<[1], [0], [0], [1], [0, 0, 1, 1], [], []>} : vector<16x32xbf16>, vector<32x96xbf16>, vector<16x96xf32> -> vector<16x96xf32>
    %c0_26 = arith.constant 0 : index
    %c0_27 = arith.constant 0 : index
    %c0_28 = arith.constant 0 : index
    %58 = vector.load %arg8[%c0_26, %c0_27, %c0_28] : memref<2x1x96xf32, #tpu.memory_space<vmem>>, vector<1x1x96xf32>
    %59 = vector.shape_cast %58 : vector<1x1x96xf32> to vector<1x96xf32>
    %60 = vector.broadcast %59 : vector<1x96xf32> to vector<16x96xf32>
    %61 = arith.addf %57, %60 : vector<16x96xf32>
    %62 = vector.extract_strided_slice %61 {offsets = [0, 0], sizes = [16, 8], strides = [1, 1]} : vector<16x96xf32> to vector<16x8xf32>
    %63 = vector.extract_strided_slice %61 {offsets = [0, 32], sizes = [16, 8], strides = [1, 1]} : vector<16x96xf32> to vector<16x8xf32>
    %64 = vector.extract_strided_slice %61 {offsets = [0, 64], sizes = [16, 8], strides = [1, 1]} : vector<16x96xf32> to vector<16x8xf32>
    %65 = arith.truncf %62 : vector<16x8xf32> to vector<16x8xbf16>
    %66 = arith.truncf %63 : vector<16x8xf32> to vector<16x8xbf16>
    %cst_29 = arith.constant dense<0.000000e+00> : vector<16x16xf32>
    %67 = tpu.matmul %65, %66, %cst_29 {dimension_numbers = #tpu.dot_dimension_numbers<[1], [1], [0], [0], [0, 0, 1, 0], [], []>} : vector<16x8xbf16>, vector<16x8xbf16>, vector<16x16xf32> -> vector<16x16xf32>
    %cst_30 = arith.constant 0.353553385 : f32
    %68 = vector.broadcast %cst_30 : f32 to vector<16x16xf32>
    %69 = arith.mulf %67, %68 : vector<16x16xf32>
    %70 = arith.addf %69, %52 : vector<16x16xf32>
    %cst_31 = arith.constant dense<0xFF800000> : vector<16xf32>
    %71 = vector.multi_reduction <maximumf>, %70, %cst_31 [1] : vector<16x16xf32> to vector<16xf32>
    %72 = vector.shape_cast %71 : vector<16xf32> to vector<16x1xf32>
    %73 = vector.broadcast %72 : vector<16x1xf32> to vector<16x16xf32>
    %74 = arith.subf %70, %73 : vector<16x16xf32>
    %75 = math.exp %74 : vector<16x16xf32>
    %cst_32 = arith.constant dense<0.000000e+00> : vector<16xf32>
    %76 = vector.multi_reduction <add>, %75, %cst_32 [1] : vector<16x16xf32> to vector<16xf32>
    %77 = vector.shape_cast %76 : vector<16xf32> to vector<16x1xf32>
    %78 = tpu.reciprocal %77 {approx = true} : vector<16x1xf32> -> vector<16x1xf32>
    %79 = vector.broadcast %78 : vector<16x1xf32> to vector<16x16xf32>
    %80 = arith.mulf %75, %79 : vector<16x16xf32>
    %81 = arith.truncf %80 : vector<16x16xf32> to vector<16x16xbf16>
    %82 = arith.truncf %64 : vector<16x8xf32> to vector<16x8xbf16>
    %cst_33 = arith.constant dense<0.000000e+00> : vector<16x8xf32>
    %83 = tpu.matmul %81, %82, %cst_33 {dimension_numbers = #tpu.dot_dimension_numbers<[1], [0], [0], [1], [0, 0, 1, 1], [], []>} : vector<16x16xbf16>, vector<16x8xbf16>, vector<16x8xf32> -> vector<16x8xf32>
    %84 = vector.extract_strided_slice %61 {offsets = [0, 8], sizes = [16, 8], strides = [1, 1]} : vector<16x96xf32> to vector<16x8xf32>
    %85 = vector.extract_strided_slice %61 {offsets = [0, 40], sizes = [16, 8], strides = [1, 1]} : vector<16x96xf32> to vector<16x8xf32>
    %86 = vector.extract_strided_slice %61 {offsets = [0, 72], sizes = [16, 8], strides = [1, 1]} : vector<16x96xf32> to vector<16x8xf32>
    %87 = arith.truncf %84 : vector<16x8xf32> to vector<16x8xbf16>
    %88 = arith.truncf %85 : vector<16x8xf32> to vector<16x8xbf16>
    %cst_34 = arith.constant dense<0.000000e+00> : vector<16x16xf32>
    %89 = tpu.matmul %87, %88, %cst_34 {dimension_numbers = #tpu.dot_dimension_numbers<[1], [1], [0], [0], [0, 0, 1, 0], [], []>} : vector<16x8xbf16>, vector<16x8xbf16>, vector<16x16xf32> -> vector<16x16xf32>
    %cst_35 = arith.constant 0.353553385 : f32
    %90 = vector.broadcast %cst_35 : f32 to vector<16x16xf32>
    %91 = arith.mulf %89, %90 : vector<16x16xf32>
    %92 = arith.addf %91, %52 : vector<16x16xf32>
    %cst_36 = arith.constant dense<0xFF800000> : vector<16xf32>
    %93 = vector.multi_reduction <maximumf>, %92, %cst_36 [1] : vector<16x16xf32> to vector<16xf32>
    %94 = vector.shape_cast %93 : vector<16xf32> to vector<16x1xf32>
    %95 = vector.broadcast %94 : vector<16x1xf32> to vector<16x16xf32>
    %96 = arith.subf %92, %95 : vector<16x16xf32>
    %97 = math.exp %96 : vector<16x16xf32>
    %cst_37 = arith.constant dense<0.000000e+00> : vector<16xf32>
    %98 = vector.multi_reduction <add>, %97, %cst_37 [1] : vector<16x16xf32> to vector<16xf32>
    %99 = vector.shape_cast %98 : vector<16xf32> to vector<16x1xf32>
    %100 = tpu.reciprocal %99 {approx = true} : vector<16x1xf32> -> vector<16x1xf32>
    %101 = vector.broadcast %100 : vector<16x1xf32> to vector<16x16xf32>
    %102 = arith.mulf %97, %101 : vector<16x16xf32>
    %103 = arith.truncf %102 : vector<16x16xf32> to vector<16x16xbf16>
    %104 = arith.truncf %86 : vector<16x8xf32> to vector<16x8xbf16>
    %cst_38 = arith.constant dense<0.000000e+00> : vector<16x8xf32>
    %105 = tpu.matmul %103, %104, %cst_38 {dimension_numbers = #tpu.dot_dimension_numbers<[1], [0], [0], [1], [0, 0, 1, 1], [], []>} : vector<16x16xbf16>, vector<16x8xbf16>, vector<16x8xf32> -> vector<16x8xf32>
    %106 = vector.extract_strided_slice %61 {offsets = [0, 16], sizes = [16, 8], strides = [1, 1]} : vector<16x96xf32> to vector<16x8xf32>
    %107 = vector.extract_strided_slice %61 {offsets = [0, 48], sizes = [16, 8], strides = [1, 1]} : vector<16x96xf32> to vector<16x8xf32>
    %108 = vector.extract_strided_slice %61 {offsets = [0, 80], sizes = [16, 8], strides = [1, 1]} : vector<16x96xf32> to vector<16x8xf32>
    %109 = arith.truncf %106 : vector<16x8xf32> to vector<16x8xbf16>
    %110 = arith.truncf %107 : vector<16x8xf32> to vector<16x8xbf16>
    %cst_39 = arith.constant dense<0.000000e+00> : vector<16x16xf32>
    %111 = tpu.matmul %109, %110, %cst_39 {dimension_numbers = #tpu.dot_dimension_numbers<[1], [1], [0], [0], [0, 0, 1, 0], [], []>} : vector<16x8xbf16>, vector<16x8xbf16>, vector<16x16xf32> -> vector<16x16xf32>
    %cst_40 = arith.constant 0.353553385 : f32
    %112 = vector.broadcast %cst_40 : f32 to vector<16x16xf32>
    %113 = arith.mulf %111, %112 : vector<16x16xf32>
    %114 = arith.addf %113, %52 : vector<16x16xf32>
    %cst_41 = arith.constant dense<0xFF800000> : vector<16xf32>
    %115 = vector.multi_reduction <maximumf>, %114, %cst_41 [1] : vector<16x16xf32> to vector<16xf32>
    %116 = vector.shape_cast %115 : vector<16xf32> to vector<16x1xf32>
    %117 = vector.broadcast %116 : vector<16x1xf32> to vector<16x16xf32>
    %118 = arith.subf %114, %117 : vector<16x16xf32>
    %119 = math.exp %118 : vector<16x16xf32>
    %cst_42 = arith.constant dense<0.000000e+00> : vector<16xf32>
    %120 = vector.multi_reduction <add>, %119, %cst_42 [1] : vector<16x16xf32> to vector<16xf32>
    %121 = vector.shape_cast %120 : vector<16xf32> to vector<16x1xf32>
    %122 = tpu.reciprocal %121 {approx = true} : vector<16x1xf32> -> vector<16x1xf32>
    %123 = vector.broadcast %122 : vector<16x1xf32> to vector<16x16xf32>
    %124 = arith.mulf %119, %123 : vector<16x16xf32>
    %125 = arith.truncf %124 : vector<16x16xf32> to vector<16x16xbf16>
    %126 = arith.truncf %108 : vector<16x8xf32> to vector<16x8xbf16>
    %cst_43 = arith.constant dense<0.000000e+00> : vector<16x8xf32>
    %127 = tpu.matmul %125, %126, %cst_43 {dimension_numbers = #tpu.dot_dimension_numbers<[1], [0], [0], [1], [0, 0, 1, 1], [], []>} : vector<16x16xbf16>, vector<16x8xbf16>, vector<16x8xf32> -> vector<16x8xf32>
    %128 = vector.extract_strided_slice %61 {offsets = [0, 24], sizes = [16, 8], strides = [1, 1]} : vector<16x96xf32> to vector<16x8xf32>
    %129 = vector.extract_strided_slice %61 {offsets = [0, 56], sizes = [16, 8], strides = [1, 1]} : vector<16x96xf32> to vector<16x8xf32>
    %130 = vector.extract_strided_slice %61 {offsets = [0, 88], sizes = [16, 8], strides = [1, 1]} : vector<16x96xf32> to vector<16x8xf32>
    %131 = arith.truncf %128 : vector<16x8xf32> to vector<16x8xbf16>
    %132 = arith.truncf %129 : vector<16x8xf32> to vector<16x8xbf16>
    %cst_44 = arith.constant dense<0.000000e+00> : vector<16x16xf32>
    %133 = tpu.matmul %131, %132, %cst_44 {dimension_numbers = #tpu.dot_dimension_numbers<[1], [1], [0], [0], [0, 0, 1, 0], [], []>} : vector<16x8xbf16>, vector<16x8xbf16>, vector<16x16xf32> -> vector<16x16xf32>
    %cst_45 = arith.constant 0.353553385 : f32
    %134 = vector.broadcast %cst_45 : f32 to vector<16x16xf32>
    %135 = arith.mulf %133, %134 : vector<16x16xf32>
    %136 = arith.addf %135, %52 : vector<16x16xf32>
    %cst_46 = arith.constant dense<0xFF800000> : vector<16xf32>
    %137 = vector.multi_reduction <maximumf>, %136, %cst_46 [1] : vector<16x16xf32> to vector<16xf32>
    %138 = vector.shape_cast %137 : vector<16xf32> to vector<16x1xf32>
    %139 = vector.broadcast %138 : vector<16x1xf32> to vector<16x16xf32>
    %140 = arith.subf %136, %139 : vector<16x16xf32>
    %141 = math.exp %140 : vector<16x16xf32>
    %cst_47 = arith.constant dense<0.000000e+00> : vector<16xf32>
    %142 = vector.multi_reduction <add>, %141, %cst_47 [1] : vector<16x16xf32> to vector<16xf32>
    %143 = vector.shape_cast %142 : vector<16xf32> to vector<16x1xf32>
    %144 = tpu.reciprocal %143 {approx = true} : vector<16x1xf32> -> vector<16x1xf32>
    %145 = vector.broadcast %144 : vector<16x1xf32> to vector<16x16xf32>
    %146 = arith.mulf %141, %145 : vector<16x16xf32>
    %147 = arith.truncf %146 : vector<16x16xf32> to vector<16x16xbf16>
    %148 = arith.truncf %130 : vector<16x8xf32> to vector<16x8xbf16>
    %cst_48 = arith.constant dense<0.000000e+00> : vector<16x8xf32>
    %149 = tpu.matmul %147, %148, %cst_48 {dimension_numbers = #tpu.dot_dimension_numbers<[1], [0], [0], [1], [0, 0, 1, 1], [], []>} : vector<16x16xbf16>, vector<16x8xbf16>, vector<16x8xf32> -> vector<16x8xf32>
    %150 = tpu.concatenate %83, %105, %127, %149 in 1 : vector<16x8xf32>, vector<16x8xf32>, vector<16x8xf32>, vector<16x8xf32> -> vector<16x32xf32>
    %c0_49 = arith.constant 0 : index
    %c0_50 = arith.constant 0 : index
    %c0_51 = arith.constant 0 : index
    %151 = vector.load %arg9[%c0_49, %c0_50, %c0_51] : memref<2x32x32xf32, #tpu.memory_space<vmem>>, vector<1x32x32xf32>
    %152 = vector.shape_cast %151 : vector<1x32x32xf32> to vector<32x32xf32>
    %153 = arith.truncf %150 : vector<16x32xf32> to vector<16x32xbf16>
    %154 = arith.truncf %152 : vector<32x32xf32> to vector<32x32xbf16>
    %cst_52 = arith.constant dense<0.000000e+00> : vector<16x32xf32>
    %155 = tpu.matmul %153, %154, %cst_52 {dimension_numbers = #tpu.dot_dimension_numbers<[1], [0], [0], [1], [0, 0, 1, 1], [], []>} : vector<16x32xbf16>, vector<32x32xbf16>, vector<16x32xf32> -> vector<16x32xf32>
    %c0_53 = arith.constant 0 : index
    %c0_54 = arith.constant 0 : index
    %c0_55 = arith.constant 0 : index
    %156 = vector.load %arg10[%c0_53, %c0_54, %c0_55] : memref<2x1x32xf32, #tpu.memory_space<vmem>>, vector<1x1x32xf32>
    %157 = vector.shape_cast %156 : vector<1x1x32xf32> to vector<1x32xf32>
    %158 = vector.broadcast %157 : vector<1x32xf32> to vector<16x32xf32>
    %159 = arith.addf %155, %158 : vector<16x32xf32>
    %160 = arith.addf %159, %37 : vector<16x32xf32>
    %c0_56 = arith.constant 0 : index
    %c0_57 = arith.constant 0 : index
    %c0_58 = arith.constant 0 : index
    %161 = vector.load %arg11[%c0_56, %c0_57, %c0_58] : memref<2x1x32xf32, #tpu.memory_space<vmem>>, vector<1x1x32xf32>
    %162 = vector.shape_cast %161 : vector<1x1x32xf32> to vector<1x32xf32>
    %c0_59 = arith.constant 0 : index
    %c0_60 = arith.constant 0 : index
    %c0_61 = arith.constant 0 : index
    %163 = vector.load %arg12[%c0_59, %c0_60, %c0_61] : memref<2x1x32xf32, #tpu.memory_space<vmem>>, vector<1x1x32xf32>
    %164 = vector.shape_cast %163 : vector<1x1x32xf32> to vector<1x32xf32>
    %cst_62 = arith.constant dense<0.000000e+00> : vector<16xf32>
    %165 = vector.multi_reduction <add>, %160, %cst_62 [1] : vector<16x32xf32> to vector<16xf32>
    %166 = vector.shape_cast %165 : vector<16xf32> to vector<16x1xf32>
    %cst_63 = arith.constant 3.200000e+01 : f32
    %167 = vector.broadcast %cst_63 : f32 to vector<16x1xf32>
    %168 = arith.divf %166, %167 : vector<16x1xf32>
    %169 = vector.broadcast %168 : vector<16x1xf32> to vector<16x32xf32>
    %170 = arith.subf %160, %169 : vector<16x32xf32>
    %171 = arith.mulf %170, %170 : vector<16x32xf32>
    %cst_64 = arith.constant dense<0.000000e+00> : vector<16xf32>
    %172 = vector.multi_reduction <add>, %171, %cst_64 [1] : vector<16x32xf32> to vector<16xf32>
    %173 = vector.shape_cast %172 : vector<16xf32> to vector<16x1xf32>
    %cst_65 = arith.constant 3.200000e+01 : f32
    %174 = vector.broadcast %cst_65 : f32 to vector<16x1xf32>
    %175 = arith.divf %173, %174 : vector<16x1xf32>
    %cst_66 = arith.constant 9.99999996E-13 : f32
    %176 = vector.broadcast %cst_66 : f32 to vector<16x1xf32>
    %177 = arith.addf %175, %176 : vector<16x1xf32>
    %178 = math.rsqrt %177 : vector<16x1xf32>
    %179 = vector.broadcast %178 : vector<16x1xf32> to vector<16x32xf32>
    %180 = arith.mulf %170, %179 : vector<16x32xf32>
    %181 = vector.broadcast %162 : vector<1x32xf32> to vector<16x32xf32>
    %182 = arith.mulf %180, %181 : vector<16x32xf32>
    %183 = vector.broadcast %164 : vector<1x32xf32> to vector<16x32xf32>
    %184 = arith.addf %182, %183 : vector<16x32xf32>
    %c0_67 = arith.constant 0 : index
    %c0_68 = arith.constant 0 : index
    %c0_69 = arith.constant 0 : index
    %185 = vector.load %arg13[%c0_67, %c0_68, %c0_69] : memref<2x32x64xf32, #tpu.memory_space<vmem>>, vector<1x32x64xf32>
    %186 = vector.shape_cast %185 : vector<1x32x64xf32> to vector<32x64xf32>
    %187 = arith.truncf %184 : vector<16x32xf32> to vector<16x32xbf16>
    %188 = arith.truncf %186 : vector<32x64xf32> to vector<32x64xbf16>
    %cst_70 = arith.constant dense<0.000000e+00> : vector<16x64xf32>
    %189 = tpu.matmul %187, %188, %cst_70 {dimension_numbers = #tpu.dot_dimension_numbers<[1], [0], [0], [1], [0, 0, 1, 1], [], []>} : vector<16x32xbf16>, vector<32x64xbf16>, vector<16x64xf32> -> vector<16x64xf32>
    %c0_71 = arith.constant 0 : index
    %c0_72 = arith.constant 0 : index
    %c0_73 = arith.constant 0 : index
    %190 = vector.load %arg14[%c0_71, %c0_72, %c0_73] : memref<2x1x64xf32, #tpu.memory_space<vmem>>, vector<1x1x64xf32>
    %191 = vector.shape_cast %190 : vector<1x1x64xf32> to vector<1x64xf32>
    %192 = vector.broadcast %191 : vector<1x64xf32> to vector<16x64xf32>
    %193 = arith.addf %189, %192 : vector<16x64xf32>
    %cst_74 = arith.constant 5.000000e-01 : f32
    %194 = vector.broadcast %cst_74 : f32 to vector<16x64xf32>
    %195 = arith.mulf %194, %193 : vector<16x64xf32>
    %cst_75 = arith.constant 4.471500e-02 : f32
    %196 = vector.broadcast %cst_75 : f32 to vector<16x64xf32>
    %197 = arith.mulf %196, %193 : vector<16x64xf32>
    %198 = arith.mulf %197, %193 : vector<16x64xf32>
    %199 = arith.mulf %198, %193 : vector<16x64xf32>
    %200 = arith.addf %193, %199 : vector<16x64xf32>
    %cst_76 = arith.constant 0.797884583 : f32
    %201 = vector.broadcast %cst_76 : f32 to vector<16x64xf32>
    %202 = arith.mulf %201, %200 : vector<16x64xf32>
    %203 = math.tanh %202 : vector<16x64xf32>
    %cst_77 = arith.constant 1.000000e+00 : f32
    %204 = vector.broadcast %cst_77 : f32 to vector<16x64xf32>
    %205 = arith.addf %204, %203 : vector<16x64xf32>
    %206 = arith.mulf %195, %205 : vector<16x64xf32>
    %c0_78 = arith.constant 0 : index
    %c0_79 = arith.constant 0 : index
    %c0_80 = arith.constant 0 : index
    %207 = vector.load %arg15[%c0_78, %c0_79, %c0_80] : memref<2x64x32xf32, #tpu.memory_space<vmem>>, vector<1x64x32xf32>
    %208 = vector.shape_cast %207 : vector<1x64x32xf32> to vector<64x32xf32>
    %209 = arith.truncf %206 : vector<16x64xf32> to vector<16x64xbf16>
    %210 = arith.truncf %208 : vector<64x32xf32> to vector<64x32xbf16>
    %cst_81 = arith.constant dense<0.000000e+00> : vector<16x32xf32>
    %211 = tpu.matmul %209, %210, %cst_81 {dimension_numbers = #tpu.dot_dimension_numbers<[1], [0], [0], [1], [0, 0, 1, 1], [], []>} : vector<16x64xbf16>, vector<64x32xbf16>, vector<16x32xf32> -> vector<16x32xf32>
    %c0_82 = arith.constant 0 : index
    %c0_83 = arith.constant 0 : index
    %c0_84 = arith.constant 0 : index
    %212 = vector.load %arg16[%c0_82, %c0_83, %c0_84] : memref<2x1x32xf32, #tpu.memory_space<vmem>>, vector<1x1x32xf32>
    %213 = vector.shape_cast %212 : vector<1x1x32xf32> to vector<1x32xf32>
    %214 = vector.broadcast %213 : vector<1x32xf32> to vector<16x32xf32>
    %215 = arith.addf %211, %214 : vector<16x32xf32>
    %216 = arith.addf %215, %184 : vector<16x32xf32>
    %c0_85 = arith.constant 0 : index
    %c0_86 = arith.constant 0 : index
    %c0_87 = arith.constant 0 : index
    %217 = vector.load %arg17[%c0_85, %c0_86, %c0_87] : memref<2x1x32xf32, #tpu.memory_space<vmem>>, vector<1x1x32xf32>
    %218 = vector.shape_cast %217 : vector<1x1x32xf32> to vector<1x32xf32>
    %c0_88 = arith.constant 0 : index
    %c0_89 = arith.constant 0 : index
    %c0_90 = arith.constant 0 : index
    %219 = vector.load %arg18[%c0_88, %c0_89, %c0_90] : memref<2x1x32xf32, #tpu.memory_space<vmem>>, vector<1x1x32xf32>
    %220 = vector.shape_cast %219 : vector<1x1x32xf32> to vector<1x32xf32>
    %cst_91 = arith.constant dense<0.000000e+00> : vector<16xf32>
    %221 = vector.multi_reduction <add>, %216, %cst_91 [1] : vector<16x32xf32> to vector<16xf32>
    %222 = vector.shape_cast %221 : vector<16xf32> to vector<16x1xf32>
    %cst_92 = arith.constant 3.200000e+01 : f32
    %223 = vector.broadcast %cst_92 : f32 to vector<16x1xf32>
    %224 = arith.divf %222, %223 : vector<16x1xf32>
    %225 = vector.broadcast %224 : vector<16x1xf32> to vector<16x32xf32>
    %226 = arith.subf %216, %225 : vector<16x32xf32>
    %227 = arith.mulf %226, %226 : vector<16x32xf32>
    %cst_93 = arith.constant dense<0.000000e+00> : vector<16xf32>
    %228 = vector.multi_reduction <add>, %227, %cst_93 [1] : vector<16x32xf32> to vector<16xf32>
    %229 = vector.shape_cast %228 : vector<16xf32> to vector<16x1xf32>
    %cst_94 = arith.constant 3.200000e+01 : f32
    %230 = vector.broadcast %cst_94 : f32 to vector<16x1xf32>
    %231 = arith.divf %229, %230 : vector<16x1xf32>
    %cst_95 = arith.constant 9.99999996E-13 : f32
    %232 = vector.broadcast %cst_95 : f32 to vector<16x1xf32>
    %233 = arith.addf %231, %232 : vector<16x1xf32>
    %234 = math.rsqrt %233 : vector<16x1xf32>
    %235 = vector.broadcast %234 : vector<16x1xf32> to vector<16x32xf32>
    %236 = arith.mulf %226, %235 : vector<16x32xf32>
    %237 = vector.broadcast %218 : vector<1x32xf32> to vector<16x32xf32>
    %238 = arith.mulf %236, %237 : vector<16x32xf32>
    %239 = vector.broadcast %220 : vector<1x32xf32> to vector<16x32xf32>
    %240 = arith.addf %238, %239 : vector<16x32xf32>
    %c1 = arith.constant 1 : index
    %c0_96 = arith.constant 0 : index
    %c0_97 = arith.constant 0 : index
    %241 = vector.load %arg7[%c1, %c0_96, %c0_97] : memref<2x32x96xf32, #tpu.memory_space<vmem>>, vector<1x32x96xf32>
    %242 = vector.shape_cast %241 : vector<1x32x96xf32> to vector<32x96xf32>
    %243 = arith.truncf %240 : vector<16x32xf32> to vector<16x32xbf16>
    %244 = arith.truncf %242 : vector<32x96xf32> to vector<32x96xbf16>
    %cst_98 = arith.constant dense<0.000000e+00> : vector<16x96xf32>
    %245 = tpu.matmul %243, %244, %cst_98 {dimension_numbers = #tpu.dot_dimension_numbers<[1], [0], [0], [1], [0, 0, 1, 1], [], []>} : vector<16x32xbf16>, vector<32x96xbf16>, vector<16x96xf32> -> vector<16x96xf32>
    %c1_99 = arith.constant 1 : index
    %c0_100 = arith.constant 0 : index
    %c0_101 = arith.constant 0 : index
    %246 = vector.load %arg8[%c1_99, %c0_100, %c0_101] : memref<2x1x96xf32, #tpu.memory_space<vmem>>, vector<1x1x96xf32>
    %247 = vector.shape_cast %246 : vector<1x1x96xf32> to vector<1x96xf32>
    %248 = vector.broadcast %247 : vector<1x96xf32> to vector<16x96xf32>
    %249 = arith.addf %245, %248 : vector<16x96xf32>
    %250 = vector.extract_strided_slice %249 {offsets = [0, 0], sizes = [16, 8], strides = [1, 1]} : vector<16x96xf32> to vector<16x8xf32>
    %251 = vector.extract_strided_slice %249 {offsets = [0, 32], sizes = [16, 8], strides = [1, 1]} : vector<16x96xf32> to vector<16x8xf32>
    %252 = vector.extract_strided_slice %249 {offsets = [0, 64], sizes = [16, 8], strides = [1, 1]} : vector<16x96xf32> to vector<16x8xf32>
    %253 = arith.truncf %250 : vector<16x8xf32> to vector<16x8xbf16>
    %254 = arith.truncf %251 : vector<16x8xf32> to vector<16x8xbf16>
    %cst_102 = arith.constant dense<0.000000e+00> : vector<16x16xf32>
    %255 = tpu.matmul %253, %254, %cst_102 {dimension_numbers = #tpu.dot_dimension_numbers<[1], [1], [0], [0], [0, 0, 1, 0], [], []>} : vector<16x8xbf16>, vector<16x8xbf16>, vector<16x16xf32> -> vector<16x16xf32>
    %cst_103 = arith.constant 0.353553385 : f32
    %256 = vector.broadcast %cst_103 : f32 to vector<16x16xf32>
    %257 = arith.mulf %255, %256 : vector<16x16xf32>
    %258 = arith.addf %257, %52 : vector<16x16xf32>
    %cst_104 = arith.constant dense<0xFF800000> : vector<16xf32>
    %259 = vector.multi_reduction <maximumf>, %258, %cst_104 [1] : vector<16x16xf32> to vector<16xf32>
    %260 = vector.shape_cast %259 : vector<16xf32> to vector<16x1xf32>
    %261 = vector.broadcast %260 : vector<16x1xf32> to vector<16x16xf32>
    %262 = arith.subf %258, %261 : vector<16x16xf32>
    %263 = math.exp %262 : vector<16x16xf32>
    %cst_105 = arith.constant dense<0.000000e+00> : vector<16xf32>
    %264 = vector.multi_reduction <add>, %263, %cst_105 [1] : vector<16x16xf32> to vector<16xf32>
    %265 = vector.shape_cast %264 : vector<16xf32> to vector<16x1xf32>
    %266 = tpu.reciprocal %265 {approx = true} : vector<16x1xf32> -> vector<16x1xf32>
    %267 = vector.broadcast %266 : vector<16x1xf32> to vector<16x16xf32>
    %268 = arith.mulf %263, %267 : vector<16x16xf32>
    %269 = arith.truncf %268 : vector<16x16xf32> to vector<16x16xbf16>
    %270 = arith.truncf %252 : vector<16x8xf32> to vector<16x8xbf16>
    %cst_106 = arith.constant dense<0.000000e+00> : vector<16x8xf32>
    %271 = tpu.matmul %269, %270, %cst_106 {dimension_numbers = #tpu.dot_dimension_numbers<[1], [0], [0], [1], [0, 0, 1, 1], [], []>} : vector<16x16xbf16>, vector<16x8xbf16>, vector<16x8xf32> -> vector<16x8xf32>
    %272 = vector.extract_strided_slice %249 {offsets = [0, 8], sizes = [16, 8], strides = [1, 1]} : vector<16x96xf32> to vector<16x8xf32>
    %273 = vector.extract_strided_slice %249 {offsets = [0, 40], sizes = [16, 8], strides = [1, 1]} : vector<16x96xf32> to vector<16x8xf32>
    %274 = vector.extract_strided_slice %249 {offsets = [0, 72], sizes = [16, 8], strides = [1, 1]} : vector<16x96xf32> to vector<16x8xf32>
    %275 = arith.truncf %272 : vector<16x8xf32> to vector<16x8xbf16>
    %276 = arith.truncf %273 : vector<16x8xf32> to vector<16x8xbf16>
    %cst_107 = arith.constant dense<0.000000e+00> : vector<16x16xf32>
    %277 = tpu.matmul %275, %276, %cst_107 {dimension_numbers = #tpu.dot_dimension_numbers<[1], [1], [0], [0], [0, 0, 1, 0], [], []>} : vector<16x8xbf16>, vector<16x8xbf16>, vector<16x16xf32> -> vector<16x16xf32>
    %cst_108 = arith.constant 0.353553385 : f32
    %278 = vector.broadcast %cst_108 : f32 to vector<16x16xf32>
    %279 = arith.mulf %277, %278 : vector<16x16xf32>
    %280 = arith.addf %279, %52 : vector<16x16xf32>
    %cst_109 = arith.constant dense<0xFF800000> : vector<16xf32>
    %281 = vector.multi_reduction <maximumf>, %280, %cst_109 [1] : vector<16x16xf32> to vector<16xf32>
    %282 = vector.shape_cast %281 : vector<16xf32> to vector<16x1xf32>
    %283 = vector.broadcast %282 : vector<16x1xf32> to vector<16x16xf32>
    %284 = arith.subf %280, %283 : vector<16x16xf32>
    %285 = math.exp %284 : vector<16x16xf32>
    %cst_110 = arith.constant dense<0.000000e+00> : vector<16xf32>
    %286 = vector.multi_reduction <add>, %285, %cst_110 [1] : vector<16x16xf32> to vector<16xf32>
    %287 = vector.shape_cast %286 : vector<16xf32> to vector<16x1xf32>
    %288 = tpu.reciprocal %287 {approx = true} : vector<16x1xf32> -> vector<16x1xf32>
    %289 = vector.broadcast %288 : vector<16x1xf32> to vector<16x16xf32>
    %290 = arith.mulf %285, %289 : vector<16x16xf32>
    %291 = arith.truncf %290 : vector<16x16xf32> to vector<16x16xbf16>
    %292 = arith.truncf %274 : vector<16x8xf32> to vector<16x8xbf16>
    %cst_111 = arith.constant dense<0.000000e+00> : vector<16x8xf32>
    %293 = tpu.matmul %291, %292, %cst_111 {dimension_numbers = #tpu.dot_dimension_numbers<[1], [0], [0], [1], [0, 0, 1, 1], [], []>} : vector<16x16xbf16>, vector<16x8xbf16>, vector<16x8xf32> -> vector<16x8xf32>
    %294 = vector.extract_strided_slice %249 {offsets = [0, 16], sizes = [16, 8], strides = [1, 1]} : vector<16x96xf32> to vector<16x8xf32>
    %295 = vector.extract_strided_slice %249 {offsets = [0, 48], sizes = [16, 8], strides = [1, 1]} : vector<16x96xf32> to vector<16x8xf32>
    %296 = vector.extract_strided_slice %249 {offsets = [0, 80], sizes = [16, 8], strides = [1, 1]} : vector<16x96xf32> to vector<16x8xf32>
    %297 = arith.truncf %294 : vector<16x8xf32> to vector<16x8xbf16>
    %298 = arith.truncf %295 : vector<16x8xf32> to vector<16x8xbf16>
    %cst_112 = arith.constant dense<0.000000e+00> : vector<16x16xf32>
    %299 = tpu.matmul %297, %298, %cst_112 {dimension_numbers = #tpu.dot_dimension_numbers<[1], [1], [0], [0], [0, 0, 1, 0], [], []>} : vector<16x8xbf16>, vector<16x8xbf16>, vector<16x16xf32> -> vector<16x16xf32>
    %cst_113 = arith.constant 0.353553385 : f32
    %300 = vector.broadcast %cst_113 : f32 to vector<16x16xf32>
    %301 = arith.mulf %299, %300 : vector<16x16xf32>
    %302 = arith.addf %301, %52 : vector<16x16xf32>
    %cst_114 = arith.constant dense<0xFF800000> : vector<16xf32>
    %303 = vector.multi_reduction <maximumf>, %302, %cst_114 [1] : vector<16x16xf32> to vector<16xf32>
    %304 = vector.shape_cast %303 : vector<16xf32> to vector<16x1xf32>
    %305 = vector.broadcast %304 : vector<16x1xf32> to vector<16x16xf32>
    %306 = arith.subf %302, %305 : vector<16x16xf32>
    %307 = math.exp %306 : vector<16x16xf32>
    %cst_115 = arith.constant dense<0.000000e+00> : vector<16xf32>
    %308 = vector.multi_reduction <add>, %307, %cst_115 [1] : vector<16x16xf32> to vector<16xf32>
    %309 = vector.shape_cast %308 : vector<16xf32> to vector<16x1xf32>
    %310 = tpu.reciprocal %309 {approx = true} : vector<16x1xf32> -> vector<16x1xf32>
    %311 = vector.broadcast %310 : vector<16x1xf32> to vector<16x16xf32>
    %312 = arith.mulf %307, %311 : vector<16x16xf32>
    %313 = arith.truncf %312 : vector<16x16xf32> to vector<16x16xbf16>
    %314 = arith.truncf %296 : vector<16x8xf32> to vector<16x8xbf16>
    %cst_116 = arith.constant dense<0.000000e+00> : vector<16x8xf32>
    %315 = tpu.matmul %313, %314, %cst_116 {dimension_numbers = #tpu.dot_dimension_numbers<[1], [0], [0], [1], [0, 0, 1, 1], [], []>} : vector<16x16xbf16>, vector<16x8xbf16>, vector<16x8xf32> -> vector<16x8xf32>
    %316 = vector.extract_strided_slice %249 {offsets = [0, 24], sizes = [16, 8], strides = [1, 1]} : vector<16x96xf32> to vector<16x8xf32>
    %317 = vector.extract_strided_slice %249 {offsets = [0, 56], sizes = [16, 8], strides = [1, 1]} : vector<16x96xf32> to vector<16x8xf32>
    %318 = vector.extract_strided_slice %249 {offsets = [0, 88], sizes = [16, 8], strides = [1, 1]} : vector<16x96xf32> to vector<16x8xf32>
    %319 = arith.truncf %316 : vector<16x8xf32> to vector<16x8xbf16>
    %320 = arith.truncf %317 : vector<16x8xf32> to vector<16x8xbf16>
    %cst_117 = arith.constant dense<0.000000e+00> : vector<16x16xf32>
    %321 = tpu.matmul %319, %320, %cst_117 {dimension_numbers = #tpu.dot_dimension_numbers<[1], [1], [0], [0], [0, 0, 1, 0], [], []>} : vector<16x8xbf16>, vector<16x8xbf16>, vector<16x16xf32> -> vector<16x16xf32>
    %cst_118 = arith.constant 0.353553385 : f32
    %322 = vector.broadcast %cst_118 : f32 to vector<16x16xf32>
    %323 = arith.mulf %321, %322 : vector<16x16xf32>
    %324 = arith.addf %323, %52 : vector<16x16xf32>
    %cst_119 = arith.constant dense<0xFF800000> : vector<16xf32>
    %325 = vector.multi_reduction <maximumf>, %324, %cst_119 [1] : vector<16x16xf32> to vector<16xf32>
    %326 = vector.shape_cast %325 : vector<16xf32> to vector<16x1xf32>
    %327 = vector.broadcast %326 : vector<16x1xf32> to vector<16x16xf32>
    %328 = arith.subf %324, %327 : vector<16x16xf32>
    %329 = math.exp %328 : vector<16x16xf32>
    %cst_120 = arith.constant dense<0.000000e+00> : vector<16xf32>
    %330 = vector.multi_reduction <add>, %329, %cst_120 [1] : vector<16x16xf32> to vector<16xf32>
    %331 = vector.shape_cast %330 : vector<16xf32> to vector<16x1xf32>
    %332 = tpu.reciprocal %331 {approx = true} : vector<16x1xf32> -> vector<16x1xf32>
    %333 = vector.broadcast %332 : vector<16x1xf32> to vector<16x16xf32>
    %334 = arith.mulf %329, %333 : vector<16x16xf32>
    %335 = arith.truncf %334 : vector<16x16xf32> to vector<16x16xbf16>
    %336 = arith.truncf %318 : vector<16x8xf32> to vector<16x8xbf16>
    %cst_121 = arith.constant dense<0.000000e+00> : vector<16x8xf32>
    %337 = tpu.matmul %335, %336, %cst_121 {dimension_numbers = #tpu.dot_dimension_numbers<[1], [0], [0], [1], [0, 0, 1, 1], [], []>} : vector<16x16xbf16>, vector<16x8xbf16>, vector<16x8xf32> -> vector<16x8xf32>
    %338 = tpu.concatenate %271, %293, %315, %337 in 1 : vector<16x8xf32>, vector<16x8xf32>, vector<16x8xf32>, vector<16x8xf32> -> vector<16x32xf32>
    %c1_122 = arith.constant 1 : index
    %c0_123 = arith.constant 0 : index
    %c0_124 = arith.constant 0 : index
    %339 = vector.load %arg9[%c1_122, %c0_123, %c0_124] : memref<2x32x32xf32, #tpu.memory_space<vmem>>, vector<1x32x32xf32>
    %340 = vector.shape_cast %339 : vector<1x32x32xf32> to vector<32x32xf32>
    %341 = arith.truncf %338 : vector<16x32xf32> to vector<16x32xbf16>
    %342 = arith.truncf %340 : vector<32x32xf32> to vector<32x32xbf16>
    %cst_125 = arith.constant dense<0.000000e+00> : vector<16x32xf32>
    %343 = tpu.matmul %341, %342, %cst_125 {dimension_numbers = #tpu.dot_dimension_numbers<[1], [0], [0], [1], [0, 0, 1, 1], [], []>} : vector<16x32xbf16>, vector<32x32xbf16>, vector<16x32xf32> -> vector<16x32xf32>
    %c1_126 = arith.constant 1 : index
    %c0_127 = arith.constant 0 : index
    %c0_128 = arith.constant 0 : index
    %344 = vector.load %arg10[%c1_126, %c0_127, %c0_128] : memref<2x1x32xf32, #tpu.memory_space<vmem>>, vector<1x1x32xf32>
    %345 = vector.shape_cast %344 : vector<1x1x32xf32> to vector<1x32xf32>
    %346 = vector.broadcast %345 : vector<1x32xf32> to vector<16x32xf32>
    %347 = arith.addf %343, %346 : vector<16x32xf32>
    %348 = arith.addf %347, %240 : vector<16x32xf32>
    %c1_129 = arith.constant 1 : index
    %c0_130 = arith.constant 0 : index
    %c0_131 = arith.constant 0 : index
    %349 = vector.load %arg11[%c1_129, %c0_130, %c0_131] : memref<2x1x32xf32, #tpu.memory_space<vmem>>, vector<1x1x32xf32>
    %350 = vector.shape_cast %349 : vector<1x1x32xf32> to vector<1x32xf32>
    %c1_132 = arith.constant 1 : index
    %c0_133 = arith.constant 0 : index
    %c0_134 = arith.constant 0 : index
    %351 = vector.load %arg12[%c1_132, %c0_133, %c0_134] : memref<2x1x32xf32, #tpu.memory_space<vmem>>, vector<1x1x32xf32>
    %352 = vector.shape_cast %351 : vector<1x1x32xf32> to vector<1x32xf32>
    %cst_135 = arith.constant dense<0.000000e+00> : vector<16xf32>
    %353 = vector.multi_reduction <add>, %348, %cst_135 [1] : vector<16x32xf32> to vector<16xf32>
    %354 = vector.shape_cast %353 : vector<16xf32> to vector<16x1xf32>
    %cst_136 = arith.constant 3.200000e+01 : f32
    %355 = vector.broadcast %cst_136 : f32 to vector<16x1xf32>
    %356 = arith.divf %354, %355 : vector<16x1xf32>
    %357 = vector.broadcast %356 : vector<16x1xf32> to vector<16x32xf32>
    %358 = arith.subf %348, %357 : vector<16x32xf32>
    %359 = arith.mulf %358, %358 : vector<16x32xf32>
    %cst_137 = arith.constant dense<0.000000e+00> : vector<16xf32>
    %360 = vector.multi_reduction <add>, %359, %cst_137 [1] : vector<16x32xf32> to vector<16xf32>
    %361 = vector.shape_cast %360 : vector<16xf32> to vector<16x1xf32>
    %cst_138 = arith.constant 3.200000e+01 : f32
    %362 = vector.broadcast %cst_138 : f32 to vector<16x1xf32>
    %363 = arith.divf %361, %362 : vector<16x1xf32>
    %cst_139 = arith.constant 9.99999996E-13 : f32
    %364 = vector.broadcast %cst_139 : f32 to vector<16x1xf32>
    %365 = arith.addf %363, %364 : vector<16x1xf32>
    %366 = math.rsqrt %365 : vector<16x1xf32>
    %367 = vector.broadcast %366 : vector<16x1xf32> to vector<16x32xf32>
    %368 = arith.mulf %358, %367 : vector<16x32xf32>
    %369 = vector.broadcast %350 : vector<1x32xf32> to vector<16x32xf32>
    %370 = arith.mulf %368, %369 : vector<16x32xf32>
    %371 = vector.broadcast %352 : vector<1x32xf32> to vector<16x32xf32>
    %372 = arith.addf %370, %371 : vector<16x32xf32>
    %c1_140 = arith.constant 1 : index
    %c0_141 = arith.constant 0 : index
    %c0_142 = arith.constant 0 : index
    %373 = vector.load %arg13[%c1_140, %c0_141, %c0_142] : memref<2x32x64xf32, #tpu.memory_space<vmem>>, vector<1x32x64xf32>
    %374 = vector.shape_cast %373 : vector<1x32x64xf32> to vector<32x64xf32>
    %375 = arith.truncf %372 : vector<16x32xf32> to vector<16x32xbf16>
    %376 = arith.truncf %374 : vector<32x64xf32> to vector<32x64xbf16>
    %cst_143 = arith.constant dense<0.000000e+00> : vector<16x64xf32>
    %377 = tpu.matmul %375, %376, %cst_143 {dimension_numbers = #tpu.dot_dimension_numbers<[1], [0], [0], [1], [0, 0, 1, 1], [], []>} : vector<16x32xbf16>, vector<32x64xbf16>, vector<16x64xf32> -> vector<16x64xf32>
    %c1_144 = arith.constant 1 : index
    %c0_145 = arith.constant 0 : index
    %c0_146 = arith.constant 0 : index
    %378 = vector.load %arg14[%c1_144, %c0_145, %c0_146] : memref<2x1x64xf32, #tpu.memory_space<vmem>>, vector<1x1x64xf32>
    %379 = vector.shape_cast %378 : vector<1x1x64xf32> to vector<1x64xf32>
    %380 = vector.broadcast %379 : vector<1x64xf32> to vector<16x64xf32>
    %381 = arith.addf %377, %380 : vector<16x64xf32>
    %cst_147 = arith.constant 5.000000e-01 : f32
    %382 = vector.broadcast %cst_147 : f32 to vector<16x64xf32>
    %383 = arith.mulf %382, %381 : vector<16x64xf32>
    %cst_148 = arith.constant 4.471500e-02 : f32
    %384 = vector.broadcast %cst_148 : f32 to vector<16x64xf32>
    %385 = arith.mulf %384, %381 : vector<16x64xf32>
    %386 = arith.mulf %385, %381 : vector<16x64xf32>
    %387 = arith.mulf %386, %381 : vector<16x64xf32>
    %388 = arith.addf %381, %387 : vector<16x64xf32>
    %cst_149 = arith.constant 0.797884583 : f32
    %389 = vector.broadcast %cst_149 : f32 to vector<16x64xf32>
    %390 = arith.mulf %389, %388 : vector<16x64xf32>
    %391 = math.tanh %390 : vector<16x64xf32>
    %cst_150 = arith.constant 1.000000e+00 : f32
    %392 = vector.broadcast %cst_150 : f32 to vector<16x64xf32>
    %393 = arith.addf %392, %391 : vector<16x64xf32>
    %394 = arith.mulf %383, %393 : vector<16x64xf32>
    %c1_151 = arith.constant 1 : index
    %c0_152 = arith.constant 0 : index
    %c0_153 = arith.constant 0 : index
    %395 = vector.load %arg15[%c1_151, %c0_152, %c0_153] : memref<2x64x32xf32, #tpu.memory_space<vmem>>, vector<1x64x32xf32>
    %396 = vector.shape_cast %395 : vector<1x64x32xf32> to vector<64x32xf32>
    %397 = arith.truncf %394 : vector<16x64xf32> to vector<16x64xbf16>
    %398 = arith.truncf %396 : vector<64x32xf32> to vector<64x32xbf16>
    %cst_154 = arith.constant dense<0.000000e+00> : vector<16x32xf32>
    %399 = tpu.matmul %397, %398, %cst_154 {dimension_numbers = #tpu.dot_dimension_numbers<[1], [0], [0], [1], [0, 0, 1, 1], [], []>} : vector<16x64xbf16>, vector<64x32xbf16>, vector<16x32xf32> -> vector<16x32xf32>
    %c1_155 = arith.constant 1 : index
    %c0_156 = arith.constant 0 : index
    %c0_157 = arith.constant 0 : index
    %400 = vector.load %arg16[%c1_155, %c0_156, %c0_157] : memref<2x1x32xf32, #tpu.memory_space<vmem>>, vector<1x1x32xf32>
    %401 = vector.shape_cast %400 : vector<1x1x32xf32> to vector<1x32xf32>
    %402 = vector.broadcast %401 : vector<1x32xf32> to vector<16x32xf32>
    %403 = arith.addf %399, %402 : vector<16x32xf32>
    %404 = arith.addf %403, %372 : vector<16x32xf32>
    %c1_158 = arith.constant 1 : index
    %c0_159 = arith.constant 0 : index
    %c0_160 = arith.constant 0 : index
    %405 = vector.load %arg17[%c1_158, %c0_159, %c0_160] : memref<2x1x32xf32, #tpu.memory_space<vmem>>, vector<1x1x32xf32>
    %406 = vector.shape_cast %405 : vector<1x1x32xf32> to vector<1x32xf32>
    %c1_161 = arith.constant 1 : index
    %c0_162 = arith.constant 0 : index
    %c0_163 = arith.constant 0 : index
    %407 = vector.load %arg18[%c1_161, %c0_162, %c0_163] : memref<2x1x32xf32, #tpu.memory_space<vmem>>, vector<1x1x32xf32>
    %408 = vector.shape_cast %407 : vector<1x1x32xf32> to vector<1x32xf32>
    %cst_164 = arith.constant dense<0.000000e+00> : vector<16xf32>
    %409 = vector.multi_reduction <add>, %404, %cst_164 [1] : vector<16x32xf32> to vector<16xf32>
    %410 = vector.shape_cast %409 : vector<16xf32> to vector<16x1xf32>
    %cst_165 = arith.constant 3.200000e+01 : f32
    %411 = vector.broadcast %cst_165 : f32 to vector<16x1xf32>
    %412 = arith.divf %410, %411 : vector<16x1xf32>
    %413 = vector.broadcast %412 : vector<16x1xf32> to vector<16x32xf32>
    %414 = arith.subf %404, %413 : vector<16x32xf32>
    %415 = arith.mulf %414, %414 : vector<16x32xf32>
    %cst_166 = arith.constant dense<0.000000e+00> : vector<16xf32>
    %416 = vector.multi_reduction <add>, %415, %cst_166 [1] : vector<16x32xf32> to vector<16xf32>
    %417 = vector.shape_cast %416 : vector<16xf32> to vector<16x1xf32>
    %cst_167 = arith.constant 3.200000e+01 : f32
    %418 = vector.broadcast %cst_167 : f32 to vector<16x1xf32>
    %419 = arith.divf %417, %418 : vector<16x1xf32>
    %cst_168 = arith.constant 9.99999996E-13 : f32
    %420 = vector.broadcast %cst_168 : f32 to vector<16x1xf32>
    %421 = arith.addf %419, %420 : vector<16x1xf32>
    %422 = math.rsqrt %421 : vector<16x1xf32>
    %423 = vector.broadcast %422 : vector<16x1xf32> to vector<16x32xf32>
    %424 = arith.mulf %414, %423 : vector<16x32xf32>
    %425 = vector.broadcast %406 : vector<1x32xf32> to vector<16x32xf32>
    %426 = arith.mulf %424, %425 : vector<16x32xf32>
    %427 = vector.broadcast %408 : vector<1x32xf32> to vector<16x32xf32>
    %428 = arith.addf %426, %427 : vector<16x32xf32>
    %429 = vector.extract_strided_slice %428 {offsets = [0, 0], sizes = [1, 32], strides = [1, 1]} : vector<16x32xf32> to vector<1x32xf32>
    %430 = vector.extract_strided_slice %428 {offsets = [8, 0], sizes = [1, 32], strides = [1, 1]} : vector<16x32xf32> to vector<1x32xf32>
    %431 = tpu.concatenate %429, %430 in 0 : vector<1x32xf32>, vector<1x32xf32> -> vector<2x32xf32>
    %c0_169 = arith.constant 0 : index
    %c0_170 = arith.constant 0 : index
    %432 = vector.load %arg19[%c0_169, %c0_170] : memref<32x32xf32, #tpu.memory_space<vmem>>, vector<32x32xf32>
    %433 = arith.truncf %431 : vector<2x32xf32> to vector<2x32xbf16>
    %434 = arith.truncf %432 : vector<32x32xf32> to vector<32x32xbf16>
    %cst_171 = arith.constant dense<0.000000e+00> : vector<2x32xf32>
    %435 = tpu.matmul %433, %434, %cst_171 {dimension_numbers = #tpu.dot_dimension_numbers<[1], [0], [0], [1], [0, 0, 1, 1], [], []>} : vector<2x32xbf16>, vector<32x32xbf16>, vector<2x32xf32> -> vector<2x32xf32>
    %c0_172 = arith.constant 0 : index
    %c0_173 = arith.constant 0 : index
    %436 = vector.load %arg20[%c0_172, %c0_173] : memref<1x32xf32, #tpu.memory_space<vmem>>, vector<1x32xf32>
    %437 = vector.broadcast %436 : vector<1x32xf32> to vector<2x32xf32>
    %438 = arith.addf %435, %437 : vector<2x32xf32>
    %439 = math.tanh %438 : vector<2x32xf32>
    %c0_174 = arith.constant 0 : index
    %c0_175 = arith.constant 0 : index
    %440 = vector.load %arg21[%c0_174, %c0_175] : memref<32x4xf32, #tpu.memory_space<vmem>>, vector<32x4xf32>
    %441 = arith.truncf %439 : vector<2x32xf32> to vector<2x32xbf16>
    %442 = arith.truncf %440 : vector<32x4xf32> to vector<32x4xbf16>
    %cst_176 = arith.constant dense<0.000000e+00> : vector<2x4xf32>
    %443 = tpu.matmul %441, %442, %cst_176 {dimension_numbers = #tpu.dot_dimension_numbers<[1], [0], [0], [1], [0, 0, 1, 1], [], []>} : vector<2x32xbf16>, vector<32x4xbf16>, vector<2x4xf32> -> vector<2x4xf32>
    %c0_177 = arith.constant 0 : index
    %c0_178 = arith.constant 0 : index
    %444 = vector.load %arg22[%c0_177, %c0_178] : memref<1x4xf32, #tpu.memory_space<vmem>>, vector<1x4xf32>
    %445 = vector.broadcast %444 : vector<1x4xf32> to vector<2x4xf32>
    %446 = arith.addf %443, %445 : vector<2x4xf32>
    %cst_179 = arith.constant dense<0xFF800000> : vector<2xf32>
    %447 = vector.multi_reduction <maximumf>, %446, %cst_179 [1] : vector<2x4xf32> to vector<2xf32>
    %448 = vector.shape_cast %447 : vector<2xf32> to vector<2x1xf32>
    %449 = vector.broadcast %448 : vector<2x1xf32> to vector<2x4xf32>
    %450 = arith.subf %446, %449 : vector<2x4xf32>
    %451 = math.exp %450 : vector<2x4xf32>
    %cst_180 = arith.constant dense<0.000000e+00> : vector<2xf32>
    %452 = vector.multi_reduction <add>, %451, %cst_180 [1] : vector<2x4xf32> to vector<2xf32>
    %453 = vector.shape_cast %452 : vector<2xf32> to vector<2x1xf32>
    %454 = vector.broadcast %453 : vector<2x1xf32> to vector<2x4xf32>
    %455 = arith.divf %451, %454 : vector<2x4xf32>
    %c0_181 = arith.constant 0 : index
    %c0_182 = arith.constant 0 : index
    %456 = vector.load %arg23[%c0_181, %c0_182] : memref<2x4xf32, #tpu.memory_space<vmem>>, vector<2x4xf32>
    tpu.vector_store %arg23[%c0_181, %c0_182], %455 {strides = array<i32>} : memref<2x4xf32, #tpu.memory_space<vmem>>, vector<2x4xf32>,
    return
  }
}

</mosaic_0001>

<bundles_post_ra>
// kernel: model_forward.1
= control target key start
LH: loop header
LB: loop body
LE: loop exit
PB: predicated region body
PF: predicated region fallthrough
CT: control target
= control target key end

     0   :  { %s3528_s0 = inlined_call_operand.vmem [shape: s32[16,1], index: 0, kind: input, shape index: {}]   ;;  %s3529_s1 = inlined_call_operand.vmem [shape: f32[1,16], index: 1, kind: input, shape index: {}]   ;;  %s3530_s2 = inlined_call_operand.vmem [shape: f32[50,32], index: 2, kind: input, shape index: {}]   ;;  %s3531_s3 = inlined_call_operand.vmem [shape: f32[16,32], index: 3, kind: input, shape index: {}]   ;;  %s3532_s4 = inlined_call_operand.vmem [shape: f32[2,32], index: 4, kind: input, shape index: {}]   ;;  %s3533_s5 = inlined_call_operand.vmem [shape: f32[1,32], index: 5, kind: input, shape index: {}]   ;;  %s3534_s6 = inlined_call_operand.hbm [shape: f32[1,32], index: 6, kind: input, shape index: {}]   ;;  %s3535_s7 = inlined_call_operand.vmem [shape: f32[2,32,96], index: 7, kind: input, shape index: {}]   ;;  %s3536_s8 = inlined_call_operand.vmem [shape: f32[2,1,96], index: 8, kind: input, shape index: {}]   ;;  %s3537_s9 = inlined_call_operand.vmem [shape: f32[2,32,32], index: 9, kind: input, shape index: {}]   ;;  %s3538_s10 = inlined_call_operand.vmem [shape: f32[2,1,32], index: 10, kind: input, shape index: {}]   ;;  %s3539_s11 = inlined_call_operand.vmem [shape: f32[2,1,32], index: 11, kind: input, shape index: {}]   ;;  %s3540_s12 = inlined_call_operand.vmem [shape: f32[2,1,32], index: 12, kind: input, shape index: {}]   ;;  %s3541_s13 = inlined_call_operand.vmem [shape: f32[2,32,64], index: 13, kind: input, shape index: {}]   ;;  %s3542_s14 = inlined_call_operand.hbm [shape: f32[2,1,64], index: 14, kind: input, shape index: {}]   ;;  %s3543_s15 = inlined_call_operand.vmem [shape: f32[2,64,32], index: 15, kind: input, shape index: {}]   ;;  %s3544_s16 = inlined_call_operand.hbm [shape: f32[2,1,32], index: 16, kind: input, shape index: {}]   ;;  %s3545_s17 = inlined_call_operand.vmem [shape: f32[2,1,32], index: 17, kind: input, shape index: {}]   ;;  %s3546_s18 = inlined_call_operand.vmem [shape: f32[2,1,32], index: 18, kind: input, shape index: {}]   ;;  %s3547_s19 = inlined_call_operand.vmem [shape: f32[32,32], index: 19, kind: input, shape index: {}]   ;;  %s3548_s20 = inlined_call_operand.vmem [shape: f32[1,32], index: 20, kind: input, shape index: {}]   ;;  %s3549_s21 = inlined_call_operand.vmem [shape: f32[32,4], index: 21, kind: input, shape index: {}]   ;;  %s3550_s22 = inlined_call_operand.vmem [shape: f32[1,4], index: 22, kind: input, shape index: {}]   ;;  %s3551_s23 = inlined_call_operand.hbm [shape: f32[2,4], index: 23, kind: output, shape index: {}]  }
   0x1   :  { %3562 = sst [smem:[#allocation12_spill]] %s3528_s0 }
   0x2   :  { %3563 = sst [smem:[#allocation13_spill]] %s3529_s1 }
   0x3   :  { %3564 = sst [smem:[#allocation14_spill]] %s3530_s2 }
   0x4   :  { %3565 = sst [smem:[#allocation15_spill]] %s3531_s3 }
   0x5   :  { %3566 = sst [smem:[#allocation16_spill]] %s3532_s4 }
   0x6   :  { %3567 = sst [smem:[#allocation17_spill]] %s3533_s5 }
   0x7   :  { %3568 = sst [smem:[#allocation18_spill]] %s3534_s6 }
   0x8   :  { %3569 = sst [smem:[#allocation19_spill]] %s3535_s7 }
   0x9   :  { %3570 = sst [smem:[#allocation20_spill]] %s3550_s22 }
   0xa   :  { %3571 = sst [smem:[#allocation21_spill]] %s3551_s23 }
   0xb   :  { %28 = vsyncpa [#allocation3], 0 }
   0xc   :  { %29 = vsyncpa [#allocation6], 0 }
   0xd   :  { %30 = vsyncpa [#allocation4], 0  ;;  %s2775_s4 = smov [#allocation5]   ;;  %s2681_s5 = scalar_lea.hbm %s3542_s14, 32 }
   0xe   :  { %s72_s30 = sshll.u32 %s2775_s4, 4  ;;  %p2682_p0 = scmp.ne.s32.totalorder %s3542_s14, %s2681_s5  ;;  %s73_s30 = int_to_ptr.vmem [resolvable:$true] %s72_s30 }
   0xf   :  { %p2685_p1 = scmp.lt.u32.totalorder %s2681_s5, %s3542_s14 }
  0x11   :  { %p2687_p2 = pnand %p2685_p1, %p2682_p0 }
  0x13   :  { %2690 = shalt.err (!%p2687_p2)
}
  0x14   :  { %s2691_s27 = scalar_lea.vmem %s73_s30, 32  ;;  %p2696_p4 = scmp.lt.s32.totalorder %s73_s30, %s73_s30 }
  0x15   :  { %p2692_p3 = scmp.ne.s32.totalorder %s73_s30, %s2691_s27  ;;  %p2697_p5 = scmp.lt.s32.totalorder %s2691_s27, %s2691_s27 }
  0x17   :  { %p2698_p6 = por %p2697_p5, %p2696_p4 }
  0x19   :  { %p2699_p7 = pnand %p2698_p6, %p2692_p3 }
  0x1b   :  { %2702 = shalt.err (!%p2699_p7)
}
  0x1c   :  { %s3559_s7 = smov 16   ;;  %s2777_s28 = smov 1  }
  0x1d   :  { %78 = dma.hbm_to_vmem [thread:$0]  %s3542_s14, 32, %s73_s30, [#allocation6], %s3559_s7, %s3559_s7, %s2777_s28  }
  0x1e   :  { %s2778_s0 = smov [#allocation2]   ;;  %s2779_s24 = smov [#allocation7]  }
  0x1f   :  { %s49_s4 = sshll.u32 %s2778_s0, 4  ;;  %s86_s25 = sshll.u32 %s2779_s24, 4  ;;  %s50_s4 = int_to_ptr.vmem [resolvable:$true] %s49_s4  ;;  %s87_s25 = int_to_ptr.vmem [resolvable:$true] %s86_s25 }
  0x20   :  { %s3572_s26 = sld [smem:[#allocation18_spill]] }
  0x26   :  { %s2703_s2 = scalar_lea.hbm %s3572_s26, 16 }
  0x27   :  { %p2704_p8 = scmp.ne.s32.totalorder %s3572_s26, %s2703_s2  ;;  %p2707_p9 = scmp.lt.u32.totalorder %s2703_s2, %s3572_s26 }
  0x29   :  { %p2709_p10 = pnand %p2707_p9, %p2704_p8 }
  0x2b   :  { %2712 = shalt.err (!%p2709_p10)
}
  0x2c   :  { %s2713_s14 = scalar_lea.vmem %s50_s4, 16  ;;  %s2717_s30 = scalar_lea.vmem %s50_s4, 32 }
  0x2d   :  { %p2714_p11 = scmp.ne.s32.totalorder %s50_s4, %s2713_s14  ;;  %p2718_p12 = scmp.lt.s32.totalorder %s50_s4, %s50_s4 }
  0x2e   :  { %p2719_p13 = scmp.lt.s32.totalorder %s2717_s30, %s2713_s14 }
  0x30   :  { %p2720_p0 = por %p2719_p13, %p2718_p12 }
  0x32   :  { %p2721_p1 = pnand %p2720_p0, %p2714_p11 }
  0x34   :  { %2724 = shalt.err (!%p2721_p1)
}
  0x35   :  { %52 = dma.hbm_to_vmem [thread:$0]  %s3572_s26, 16, %s50_s4, [#allocation3]  }
  0x36   :  { %s2725_s22 = scalar_lea.hbm %s3544_s16, 32 }
  0x37   :  { %p2726_p2 = scmp.ne.s32.totalorder %s3544_s16, %s2725_s22  ;;  %p2729_p3 = scmp.lt.u32.totalorder %s2725_s22, %s3544_s16 }
  0x39   :  { %p2731_p4 = pnand %p2729_p3, %p2726_p2 }
  0x3b   :  { %2734 = shalt.err (!%p2731_p4)
}
  0x3c   :  { %s2735_s6 = scalar_lea.vmem %s87_s25, 32  ;;  %p2740_p6 = scmp.lt.s32.totalorder %s87_s25, %s87_s25 }
  0x3d   :  { %p2736_p5 = scmp.ne.s32.totalorder %s87_s25, %s2735_s6  ;;  %p2741_p7 = scmp.lt.s32.totalorder %s2735_s6, %s2735_s6 }
  0x3f   :  { %p2742_p8 = por %p2741_p7, %p2740_p6 }
  0x41   :  { %p2743_p9 = pnand %p2742_p8, %p2736_p5 }
  0x43   :  { %2746 = shalt.err (!%p2743_p9)
}
  0x44   :  { %92 = dma.hbm_to_vmem [thread:$0]  %s3544_s16, 32, %s87_s25, [#allocation6], %s3559_s7, %s3559_s7, %s2777_s28  }
  0x45   :  { %2769 = dma.done.wait [#allocation3], 16  }
  0x46   :  { %2770 = vsyncadd [#allocation3], 4294967280 }
  0x47   :  { %2771 = dma.done.wait [#allocation6], 64  }
  0x48   :  { %2772 = vsyncadd [#allocation6], 4294967232  ;;  %v117_v0 = vlaneseq  ;;  %v2780_v1 = vmov 0   ;;  %v2781_v2 = vmov 0.0   ;;  %s3573_s28 = sld [smem:[#allocation13_spill]]  ;;  %s3574_s30 = sld [smem:[#allocation12_spill]] }
  0x49   :  { %2552 = vset.pattern.permute.xlu0 %v2780_v1  ;;  %2333 = vmatprep.subr.bf16.mxu0 %v2781_v2  ;;  %s3575_s0 = sld [smem:[#allocation14_spill]]  ;;  %vm2782_vm6 = vmmov 0   ;;  %vm148_vm7 = vcmask 1040384   ;;  %vm144_vm10 = vcmask 408576   ;;  %s3580_s3 = sld [smem:[#allocation15_spill]]  ;;  %vm202_vm11 = vcmask 261120  }
  0x4a   :  { %v248_v3 = vshrl.u32 %v117_v0, 7  ;;  %2345 = vmatprep.subr.bf16.mxu1 %v2781_v2  ;;  %v118_v4 = vand.u32 127, %v117_v0  ;;  %2341 = vmatprep.mubr.msk.bf16.mxu0 %vm2782_vm6, %v2781_v2  ;;  %s3581_s22 = sld [smem:[#allocation16_spill]]  ;;  %s3582_s1 = sld [smem:[#allocation19_spill]]  ;;  %vm328_vm12 = vcmask 64512   ;;  %vm380_vm13 = vcmask 130048  }
  0x4b   :  { %2349 = vmatprep.mubr.msk.bf16.mxu1 %vm2782_vm6, %v2781_v2  ;;  %s3583_s14 = sld [smem:[#allocation17_spill]]  ;;  %s2785_s24 = smov 88   ;;  %vm854_vm14 = vcmask 195584   ;;  %vm1057_vm15 = vcmask 523264  }
  0x4c   :  { %v249_v5 = vadd.s32 8, %v248_v3  ;;  %v250_v6 = vshra.s32 %v248_v3, 3  ;;  %v252_v7 = vshra.s32 %v118_v4, 3  ;;  %v259_v8 = vsub.s32 0, %v248_v3  ;;  %s2787_s23 = smov 80   ;;  %s2788_s5 = smov 72  }
  0x4d   :  { %s2789_s2 = smov 104   ;;  %s2791_s6 = smov 56  }
  0x4e   :  { %v246_v9 = vld [vmem:[%s3573_s28] sm:$0x1]  ;;  %v251_v10 = vshra.s32 %v249_v5, 3  ;;  %v116_v16 = vld [vmem:[%s3574_s30 + $0x8] sm:$0xff]  ;;  %vm253_vm1 = vcmp.eq.s32.totalorder %v250_v6, %v252_v7  ;;  %s2792_s4 = smov 64   ;;  %s3561_s26 = smov 48  }
  0x4f   :  { %v115_v11 = vld [vmem:[%s3574_s30] sm:$0xff]  ;;  %vm255_vm0 = vcmp.gt.f32.partialorder %v246_v9, 0.5  ;;  %v128_v13 = vld [vmem:[%s3575_s0 + $0x8] sm:$0xff]  ;;  %v129_v14 = vld [vmem:[%s3575_s0 + $0x10] sm:$0xff]  ;;  %s3557_s27 = smov 40   ;;  %s3560_s30 = smov 8  }
  0x50   :  { %120 = vperm.xlu0 %2552, %v115_v11   ;;  %v127_v12 = vld [vmem:[%s3575_s0] sm:$0xff]  ;;  %v256_v15 = vsel %vm255_vm0, 1, %v2780_v1  ;;  %v130_v18 = vld [vmem:[%s3575_s0 + $0x18] sm:$0xff]  ;;  %vm254_vm2 = vcmp.eq.s32.totalorder %v251_v10, %v252_v7  ;;  %v132_v22 = vld [vmem:[%s3575_s0 + $0x28] sm:$0xff]  ;;  %vm2157_vm0 = vcmask 25600  }
  0x51   :  { %v139_v17 = vpack.c.bf16 %v128_v13, %v127_v12  ;;  %v260_v19 = vrot.slane %v256_v15, %v259_v8  ;;  %v140_v20 = vpack.c.bf16 %v130_v18, %v129_v14  ;;  %v131_v21 = vld [vmem:[%s3575_s0 + $0x20] sm:$0xff]  ;;  %v133_v24 = vld [vmem:[%s3575_s0 + $0x30] sm:$0x3]  ;;  %v267_v57 = vld [vmem:[%s3582_s1 + $0x8] sm:$0xff]  ;;  %s2784_s0 = smov 96  }
  0x52   :  { %v141_v26 = vpack.c.bf16 %v132_v22, %v131_v21  ;;  %v142_v27 = vpack.c.bf16 %v133_v24, %v133_v24  ;;  %v143_v34 = vld [vmem:[%s3580_s3] sm:$0xff]  ;;  %v268_v59 = vld [vmem:[%s3582_s1 + $0x10] sm:$0xff]  ;;  %v269_v60 = vld [vmem:[%s3582_s1 + $0x18] sm:$0xff]  ;;  %s2783_s3 = smov 112  }
  0x53   :  { %2334 = vmatpush3.bf16.msra.mxu0 %v139_v17  ;;  %vm261_vm3 = vcmp.eq.s32.totalorder %v260_v19, 1  ;;  %v2189_v36 = vld [vmem:[%s3581_s22] ss:$0 sm:$0xff]  ;;  %v272_v61 = vpack.c.bf16 %v269_v60, %v268_v59  ;;  %s2786_s22 = smov 120  }
  0x54   :  { %123 = vperm.xlu0 %2552, %v116_v16   ;;  %2335 = vmatprep.subr.bf16.mxu0 %v2781_v2  ;;  %vm2990_vm4 = vmand %vm253_vm1, %vm261_vm3  ;;  %v150_v28 = vsel %vm148_vm7, %v142_v27, 0  ;;  %v266_v56 = vld [vmem:[%s3582_s1] sm:$0xff] }
  0x55   :  { %vm2997_vm5 = vmand %vm254_vm2, %vm261_vm3  ;;  %v271_v58 = vpack.c.bf16 %v267_v57, %v266_v56  ;;  %v2190_v7 = vld [vmem:[%s3583_s14] ss:$0 sm:$0xff]  ;;  %s3587_s14 = smov 16  }
  0x56   :  { %v2191_v11 = vld [vmem:[#allocation2] ss:$0 sm:$0xff] }
  0x57   :  { %2336 = vmatpush3.bf16.msra.mxu0 %v140_v20  ;;  %2346 = vmatpush3.bf16.msra.mxu1 %v271_v58  ;;  %v2192_v16 = vld [vmem:[%s3536_s8] ss:$0 sm:$0xff] }
  0x58   :  { %2337 = vmatprep.subr.bf16.mxu0 %v2781_v2  ;;  %2347 = vmatprep.subr.bf16.mxu1 %v2781_v2 }
  0x5b   :  { %2338 = vmatpush3.bf16.msra.mxu0 %v141_v26  ;;  %2348 = vmatpush3.bf16.msra.mxu1 %v272_v61 }
  0x5c   :  { %2339 = vmatprep.subr.bf16.mxu0 %v2781_v2  ;;  %2353 = vmatprep.subr.bf16.mxu1 %v2781_v2 }
  0x5f   :  { %2340 = vmatpush3.bf16.msra.mxu0 %v150_v28 }
  0x60   :  { %2359 = vmatprep.subr.bf16.mxu0 %v2781_v2 }
  0xcf   :  { %v121_v29 = vpop.permute.xlu0 %120 }
  0xd0   :  { %vm125_vm8 = vcmp.eq.s32.totalorder %v118_v4, %v121_v29 }
  0xd1   :  { %v2186_v31 = vsel %vm125_vm8, 1.0, %v2781_v2 }
  0xd3   :  { %v124_v30 = vpop.permute.xlu0 %123 }
  0xd4   :  { %vm126_vm9 = vcmp.eq.s32.totalorder %v118_v4, %v124_v30 }
  0xd5   :  { %v2187_v32 = vsel %vm126_vm9, 1.0, %v2781_v2 }
  0xd6   :  { %v138_v33 = vpack.c.bf16 %v2187_v32, %v2186_v31 }
  0xd8   :  { %2342 = vmatmul.mubr.msk.bf16.vlgmr.msra.gmra.mrb[0].mxu0 %vm144_vm10, %v138_v33 }
  0xd9   :  { %2361 = vmatprep.mubr.msk.bf16.mxu0 %vm2782_vm6, %v2781_v2 }
 0x1ab   :  { %v186_v35 = vpop.f32.mrb[0].mxu0 }
 0x1ac   :  { %v187_v37 = vadd.f32 %v186_v35, %v143_v34  ;;  %v2343_v38 = vpop.f32.mrb[1].mxu0 }
 0x1ad   :  { %v189_v39 = vpop.f32.mrb[2].mxu0 }
 0x1ae   :  { %v190_v40 = vadd.f32 %v189_v39, %v143_v34  ;;  %v2344_v41 = vpop.f32.mrb[3].mxu0  ;;  %v198_v42 = vadd.f32 %v2189_v36, %v187_v37  ;;  %v2790_v37 = vmov -10000.0  }
 0x1af   :  { %v3091_v38 = vsel %vm2990_vm4, 0.0, %v2790_v37 }
 0x1b0   :  { %v203_v43 = vsel %vm202_vm11, %v198_v42, 0.0  ;;  %v199_v44 = vadd.f32 %v2189_v36, %v190_v40 }
 0x1b1   :  { %204 = vadd.xlane.f32.xlu1 %v203_v43 }
 0x1b2   :  { %v206_v45 = vsel %vm202_vm11, %v199_v44, 0.0 }
 0x1b5   :  { %207 = vadd.xlane.f32.xlu1 %v206_v45 }
 0x23e   :  { %v205_v46 = vpop.xlane.xlu1 %204 }
 0x23f   :  { %v210_v47 = vmul.f32 0.03125, %v205_v46 }
 0x241   :  { %v212_v48 = vsub.f32 %v198_v42, %v210_v47  ;;  %v3095_v42 = vsel %vm2997_vm5, 0.0, %v2790_v37 }
 0x242   :  { %v208_v49 = vpop.xlane.xlu1 %207 }
 0x243   :  { %v211_v50 = vmul.f32 0.03125, %v208_v49  ;;  %v214_v51 = vmul.f32 %v212_v48, %v212_v48 }
 0x245   :  { %v213_v52 = vsub.f32 %v199_v44, %v211_v50  ;;  %v216_v53 = vsel %vm202_vm11, %v214_v51, 0.0 }
 0x246   :  { %217 = vadd.xlane.f32.xlu0 %v216_v53 }
 0x247   :  { %v215_v54 = vmul.f32 %v213_v52, %v213_v52 }
 0x249   :  { %v219_v55 = vsel %vm202_vm11, %v215_v54, 0.0 }
 0x24a   :  { %220 = vadd.xlane.f32.xlu1 %v219_v55 }
 0x2d3   :  { %v218_v62 = vpop.xlane.xlu0 %217 }
 0x2d4   :  { %v222_v63 = vmul.f32 0.03125, %v218_v62 }
 0x2d6   :  { %v224_v0 = vadd.f32 1e-12, %v222_v63 }
 0x2d7   :  { %v221_v1 = vpop.xlane.xlu1 %220 }
 0x2d8   :  { %2583 = vrsqrt.f32 %v224_v0  ;;  %v223_v3 = vmul.f32 0.03125, %v221_v1 }
 0x2da   :  { %v225_v4 = vadd.f32 1e-12, %v223_v3 }
 0x2dc   :  { %2585 = vrsqrt.f32 %v225_v4 }
 0x2e2   :  { %v2584_v5 = vpop.eup %2583 }
 0x2e3   :  { %v228_v6 = vmul.f32 %v2584_v5, %v212_v48 }
 0x2e5   :  { %v236_v10 = vmul.f32 %v2190_v7, %v228_v6 }
 0x2e6   :  { %v2586_v8 = vpop.eup %2585 }
 0x2e7   :  { %v229_v9 = vmul.f32 %v2586_v8, %v213_v52  ;;  %v3040_v13 = vadd.f32 %v2191_v11, %v236_v10 }
 0x2e9   :  { %v237_v12 = vmul.f32 %v2190_v7, %v229_v9 }
 0x2eb   :  { %v3042_v14 = vadd.f32 %v2191_v11, %v237_v12 }
 0x2ed   :  { %v270_v15 = vpack.c.bf16 %v3042_v14, %v3040_v13 }
 0x2ef   :  { %2350 = vmatmul.mubr.msk.bf16.vlgmr.msra.gmra.mrb[0].mxu1 %vm202_vm11, %v270_v15 }
 0x2f0   :  { %2355 = vmatprep.mubr.msk.bf16.mxu1 %vm2782_vm6, %v2781_v2 }
 0x3c2   :  { %v317_v17 = vpop.f32.mrb[0].mxu1 }
 0x3c3   :  { %v2351_v18 = vpop.f32.mrb[1].mxu1  ;;  %v318_v20 = vadd.f32 %v2192_v16, %v317_v17 }
 0x3c4   :  { %v320_v19 = vpop.f32.mrb[2].mxu1 }
 0x3c5   :  { %v321_v21 = vadd.f32 %v2192_v16, %v320_v19  ;;  %v2352_v22 = vpop.f32.mrb[3].mxu1 }
 0x3c7   :  { %v3052_v24 = vpack.c.bf16 %v321_v21, %v318_v20 }
 0x3c9   :  { %576 = vrot.lane.b32.xlu0 %v3052_v24, %s2783_s3  ;;  %326 = vrot.lane.b32.xlu1 %v3052_v24, %s2784_s0 }
 0x3cd   :  { %453 = vrot.lane.b32.xlu1 %v3052_v24, %s2785_s24 }
 0x3d1   :  { %451 = vrot.lane.b32.xlu1 %v3052_v24, %s2786_s22 }
 0x3d5   :  { %578 = vrot.lane.b32.xlu1 %v3052_v24, %s2787_s23 }
 0x3d9   :  { %703 = vrot.lane.b32.xlu1 %v3052_v24, %s2788_s5 }
 0x3dd   :  { %701 = vrot.lane.b32.xlu1 %v3052_v24, %s2789_s2 }
 0x43b   :  { %v327_v26 = vpop.permute.xlu1 %326  ;;  %v577_v34 = vpop.permute.xlu0 %576 }
 0x43c   :  { %v333_v27 = vsel %vm328_vm12, %v327_v26, 0 }
 0x43d   :  { %2354 = vmatpush3.bf16.xpose.msra.mxu1 %v333_v27 }
 0x43e   :  { %2365 = vmatprep.subr.bf16.mxu1 %v2781_v2 }
 0x43f   :  { %v454_v28 = vpop.permute.xlu1 %453 }
 0x440   :  { %v459_v30 = vsel %vm328_vm12, %v454_v28, 0 }
 0x443   :  { %v452_v29 = vpop.permute.xlu1 %451 }
 0x444   :  { %2356 = vmatmul.mubr.msk.bf16.vlgmr.msra.gmra.mrb[4].mxu1 %vm328_vm12, %v3052_v24 }
 0x445   :  { %2366 = vmatpush3.bf16.xpose.msra.mxu1 %v459_v30  ;;  %2367 = vmatprep.mubr.msk.bf16.mxu1 %vm2782_vm6, %v2781_v2 }
 0x446   :  { %2377 = vmatprep.subr.bf16.mxu1 %v2781_v2 }
 0x447   :  { %v579_v31 = vpop.permute.xlu1 %578 }
 0x448   :  { %v584_v32 = vsel %vm328_vm12, %v579_v31, 0 }
 0x44b   :  { %v704_v33 = vpop.permute.xlu1 %703 }
 0x44c   :  { %2368 = vmatmul.mubr.msk.bf16.vlgmr.msra.gmra.mrb[8].mxu1 %vm328_vm12, %v452_v29  ;;  %v709_v35 = vsel %vm328_vm12, %v704_v33, 0 }
 0x44d   :  { %2378 = vmatpush3.bf16.xpose.msra.mxu1 %v584_v32  ;;  %2379 = vmatprep.mubr.msk.bf16.mxu1 %vm2782_vm6, %v2781_v2 }
 0x44e   :  { %2389 = vmatprep.subr.bf16.mxu1 %v2781_v2 }
 0x44f   :  { %v702_v36 = vpop.permute.xlu1 %701 }
 0x454   :  { %2380 = vmatmul.mubr.msk.bf16.vlgmr.msra.gmra.mrb[12].mxu1 %vm328_vm12, %v577_v34 }
 0x455   :  { %2390 = vmatpush3.bf16.xpose.msra.mxu1 %v709_v35  ;;  %2391 = vmatprep.mubr.msk.bf16.mxu1 %vm2782_vm6, %v2781_v2 }
 0x456   :  { %2401 = vmatprep.subr.bf16.mxu1 %v2781_v2 }
 0x45c   :  { %2392 = vmatmul.mubr.msk.bf16.vlgmr.msra.gmra.mrb[16].mxu1 %vm328_vm12, %v702_v36 }
 0x45d   :  { %2405 = vmatprep.mubr.msk.bf16.mxu1 %vm2782_vm6, %v2781_v2 }
 0x517   :  { %v369_v39 = vpop.f32.mrb[4].mxu1 }
 0x518   :  { %v376_v40 = vmul.f32 0.35355338, %v369_v39  ;;  %v2357_v41 = vpop.f32.mrb[5].mxu1 }
 0x519   :  { %v372_v43 = vpop.f32.mrb[6].mxu1 }
 0x51a   :  { %v377_v44 = vmul.f32 0.35355338, %v372_v43  ;;  %v2358_v45 = vpop.f32.mrb[7].mxu1  ;;  %v378_v46 = vadd.f32 %v376_v40, %v3091_v38 }
 0x51c   :  { %v381_v47 = vsel %vm380_vm13, %v378_v46, -inf  ;;  %v379_v48 = vadd.f32 %v377_v44, %v3095_v42 }
 0x51d   :  { %382 = vmax.xlane.f32.xlu1 %v381_v47 }
 0x51e   :  { %v384_v23 = vsel %vm380_vm13, %v379_v48, -inf }
 0x51f   :  { %385 = vmax.xlane.f32.xlu0 %v384_v23  ;;  %v495_v49 = vpop.f32.mrb[8].mxu1 }
 0x520   :  { %v502_v50 = vmul.f32 0.35355338, %v495_v49  ;;  %v2369_v51 = vpop.f32.mrb[9].mxu1 }
 0x521   :  { %v498_v25 = vpop.f32.mrb[10].mxu1 }
 0x522   :  { %v503_v52 = vmul.f32 0.35355338, %v498_v25  ;;  %v2370_v53 = vpop.f32.mrb[11].mxu1  ;;  %v504_v54 = vadd.f32 %v502_v50, %v3091_v38 }
 0x524   :  { %v506_v55 = vsel %vm380_vm13, %v504_v54, -inf  ;;  %v505_v56 = vadd.f32 %v503_v52, %v3095_v42 }
 0x525   :  { %507 = vmax.xlane.f32.xlu1 %v506_v55 }
 0x526   :  { %v509_v60 = vsel %vm380_vm13, %v505_v56, -inf }
 0x527   :  { %v620_v57 = vpop.f32.mrb[12].mxu1 }
 0x528   :  { %v627_v58 = vmul.f32 0.35355338, %v620_v57  ;;  %v2381_v59 = vpop.f32.mrb[13].mxu1 }
 0x529   :  { %510 = vmax.xlane.f32.xlu1 %v509_v60  ;;  %v623_v61 = vpop.f32.mrb[14].mxu1 }
 0x52a   :  { %v628_v62 = vmul.f32 0.35355338, %v623_v61  ;;  %v2382_v63 = vpop.f32.mrb[15].mxu1  ;;  %v629_v0 = vadd.f32 %v627_v58, %v3091_v38 }
 0x52c   :  { %v631_v1 = vsel %vm380_vm13, %v629_v0, -inf  ;;  %v630_v3 = vadd.f32 %v628_v62, %v3095_v42 }
 0x52d   :  { %632 = vmax.xlane.f32.xlu0 %v631_v1 }
 0x52e   :  { %v634_v4 = vsel %vm380_vm13, %v630_v3, -inf }
 0x52f   :  { %635 = vmax.xlane.f32.xlu1 %v634_v4  ;;  %v745_v5 = vpop.f32.mrb[16].mxu1 }
 0x530   :  { %v752_v6 = vmul.f32 0.35355338, %v745_v5  ;;  %v2393_v7 = vpop.f32.mrb[17].mxu1 }
 0x531   :  { %v748_v8 = vpop.f32.mrb[18].mxu1 }
 0x532   :  { %v753_v9 = vmul.f32 0.35355338, %v748_v8  ;;  %v2394_v10 = vpop.f32.mrb[19].mxu1  ;;  %v754_v11 = vadd.f32 %v752_v6, %v3091_v38 }
 0x534   :  { %v756_v12 = vsel %vm380_vm13, %v754_v11, -inf  ;;  %v755_v15 = vadd.f32 %v753_v9, %v3095_v42 }
 0x535   :  { %757 = vmax.xlane.f32.xlu0 %v756_v12 }
 0x536   :  { %v759_v16 = vsel %vm380_vm13, %v755_v15, -inf }
 0x537   :  { %760 = vmax.xlane.f32.xlu1 %v759_v16 }
 0x5aa   :  { %v383_v17 = vpop.xlane.xlu1 %382 }
 0x5ab   :  { %v387_v18 = vsub.f32 %v378_v46, %v383_v17 }
 0x5ac   :  { %v386_v19 = vpop.xlane.xlu0 %385 }
 0x5ad   :  { %v389_v20 = vmul.f32 1.442695, %v387_v18  ;;  %v388_v21 = vsub.f32 %v379_v48, %v386_v19 }
 0x5af   :  { %2587 = vpow2.f32 %v389_v20  ;;  %v391_v22 = vmul.f32 1.442695, %v388_v21 }
 0x5b1   :  { %2589 = vpow2.f32 %v391_v22 }
 0x5b2   :  { %v508_v26 = vpop.xlane.xlu1 %507 }
 0x5b3   :  { %v512_v27 = vsub.f32 %v504_v54, %v508_v26 }
 0x5b5   :  { %v514_v28 = vmul.f32 1.442695, %v512_v27 }
 0x5b6   :  { %v511_v35 = vpop.xlane.xlu1 %510 }
 0x5b7   :  { %2591 = vpow2.f32 %v514_v28  ;;  %v513_v36 = vsub.f32 %v505_v56, %v511_v35 }
 0x5b9   :  { %v2588_v29 = vpop.eup %2587  ;;  %v516_v40 = vmul.f32 1.442695, %v513_v36 }
 0x5ba   :  { %v393_v30 = vsel %vm380_vm13, %v2588_v29, 0.0  ;;  %v633_v39 = vpop.xlane.xlu0 %632 }
 0x5bb   :  { %v2590_v31 = vpop.eup %2589  ;;  %394 = vadd.xlane.f32.xlu0 %v393_v30  ;;  %v637_v44 = vsub.f32 %v629_v0, %v633_v39  ;;  %2593 = vpow2.f32 %v516_v40 }
 0x5bc   :  { %v396_v32 = vsel %vm380_vm13, %v2590_v31, 0.0  ;;  %v636_v37 = vpop.xlane.xlu1 %635 }
 0x5bd   :  { %397 = vadd.xlane.f32.xlu1 %v396_v32  ;;  %v638_v41 = vsub.f32 %v630_v3, %v636_v37  ;;  %v639_v48 = vmul.f32 1.442695, %v637_v44 }
 0x5bf   :  { %v641_v46 = vmul.f32 1.442695, %v638_v41  ;;  %v857_v41 = vld [vmem:[%s3537_s9] sm:$0xff] }
 0x5c1   :  { %v3115_v33 = vpop.eup %2591  ;;  %2595 = vpow2.f32 %v641_v46 }
 0x5c2   :  { %v518_v34 = vsel %vm380_vm13, %v3115_v33, 0.0  ;;  %v758_v45 = vpop.xlane.xlu0 %757  ;;  %2597 = vpow2.f32 %v639_v48  ;;  %v859_v48 = vld [vmem:[%s3537_s9 + $0x10] sm:$0xff] }
 0x5c3   :  { %519 = vadd.xlane.f32.xlu0 %v518_v34  ;;  %v762_v23 = vsub.f32 %v754_v11, %v758_v45 }
 0x5c4   :  { %v761_v43 = vpop.xlane.xlu1 %760 }
 0x5c5   :  { %v763_v47 = vsub.f32 %v755_v15, %v761_v43  ;;  %v764_v50 = vmul.f32 1.442695, %v762_v23  ;;  %v2594_v51 = vpop.eup %2593  ;;  %v858_v43 = vld [vmem:[%s3537_s9 + $0x8] sm:$0xff]  ;;  %v860_v23 = vld [vmem:[%s3537_s9 + $0x18] sm:$0xff] }
 0x5c6   :  { %v521_v25 = vsel %vm380_vm13, %v2594_v51, 0.0  ;;  %v862_v46 = vpack.c.bf16 %v858_v43, %v857_v41 }
 0x5c7   :  { %v766_v49 = vmul.f32 1.442695, %v763_v47 }
 0x5c8   :  { %2402 = vmatpush3.bf16.msra.mxu1 %v862_v46 }
 0x5c9   :  { %2599 = vpow2.f32 %v766_v49  ;;  %2403 = vmatprep.subr.bf16.mxu1 %v2781_v2 }
 0x5ca   :  { %2601 = vpow2.f32 %v764_v50  ;;  %v863_v50 = vpack.c.bf16 %v860_v23, %v859_v48 }
 0x5cb   :  { %v2596_v52 = vpop.eup %2595 }
 0x5cc   :  { %v2598_v53 = vpop.eup %2597  ;;  %v646_v54 = vsel %vm380_vm13, %v2596_v52, 0.0  ;;  %2404 = vmatpush3.bf16.msra.mxu1 %v863_v50 }
 0x5cd   :  { %v643_v56 = vsel %vm380_vm13, %v2598_v53, 0.0  ;;  %2417 = vmatprep.subr.bf16.mxu1 %v2781_v2 }
 0x5ce   :  { %529 = vrot.lane.b32.xlu1 %v3052_v24, %s2791_s6 }
 0x5d3   :  { %v3125_v55 = vpop.eup %2599 }
 0x5d4   :  { %v2602_v57 = vpop.eup %2601  ;;  %v771_v58 = vsel %vm380_vm13, %v3125_v55, 0.0 }
 0x5d5   :  { %v768_v59 = vsel %vm380_vm13, %v2602_v57, 0.0 }
 0x5d9   :  { %404 = vrot.lane.b32.xlu0 %v3052_v24, %s2792_s4 }
 0x5f2   :  { %522 = vadd.xlane.f32.xlu1 %v521_v25 }
 0x5f6   :  { %647 = vadd.xlane.f32.xlu1 %v646_v54 }
 0x5f8   :  { %644 = vadd.xlane.f32.xlu0 %v643_v56 }
 0x5fa   :  { %772 = vadd.xlane.f32.xlu1 %v771_v58 }
 0x5fc   :  { %769 = vadd.xlane.f32.xlu0 %v768_v59 }
 0x60b   :  { %654 = vrot.lane.b32.xlu1 %v3052_v24, %s3561_s26 }
 0x612   :  { %779 = vrot.lane.b32.xlu0 %v3052_v24, %s3557_s27  ;;  %s3558_s27 = smov 24  }
 0x648   :  { %v395_v60 = vpop.xlane.xlu0 %394 }
 0x649   :  { %2603 = vrcp.f32 %v395_v60 }
 0x64a   :  { %v398_v61 = vpop.xlane.xlu1 %397 }
 0x64b   :  { %2605 = vrcp.f32 %v398_v61 }
 0x64e   :  { %v530_v6 = vpop.permute.xlu1 %529 }
 0x650   :  { %v520_v62 = vpop.xlane.xlu0 %519 }
 0x651   :  { %2607 = vrcp.f32 %v520_v62 }
 0x653   :  { %v2604_v63 = vpop.eup %2603 }
 0x654   :  { %v405_v0 = vpop.permute.xlu0 %404  ;;  %v401_v3 = vmul.f32 %v2604_v63, %v2588_v29 }
 0x655   :  { %v2606_v1 = vpop.eup %2605  ;;  %2360 = vmatpush3.bf16.msra.mxu0 %v405_v0 }
 0x656   :  { %v402_v4 = vmul.f32 %v2606_v1, %v2590_v31  ;;  %2371 = vmatprep.subr.bf16.mxu0 %v2781_v2 }
 0x658   :  { %v403_v5 = vpack.c.bf16 %v402_v4, %v401_v3 }
 0x65a   :  { %2362 = vmatmul.mubr.msk.bf16.vlgmr.msra.gmra.mrb[4].mxu0 %vm380_vm13, %v403_v5 }
 0x65b   :  { %2372 = vmatpush3.bf16.msra.mxu0 %v530_v6  ;;  %2373 = vmatprep.mubr.msk.bf16.mxu0 %vm2782_vm6, %v2781_v2  ;;  %v2608_v9 = vpop.eup %2607 }
 0x65c   :  { %2383 = vmatprep.subr.bf16.mxu0 %v2781_v2  ;;  %v526_v15 = vmul.f32 %v2608_v9, %v3115_v33 }
 0x67f   :  { %v523_v24 = vpop.xlane.xlu1 %522 }
 0x680   :  { %2609 = vrcp.f32 %v523_v24 }
 0x683   :  { %v648_v7 = vpop.xlane.xlu1 %647 }
 0x684   :  { %2611 = vrcp.f32 %v648_v7 }
 0x685   :  { %v645_v8 = vpop.xlane.xlu0 %644 }
 0x686   :  { %2613 = vrcp.f32 %v645_v8 }
 0x687   :  { %v773_v10 = vpop.xlane.xlu1 %772 }
 0x689   :  { %v770_v11 = vpop.xlane.xlu0 %769 }
 0x68a   :  { %v2610_v12 = vpop.eup %2609  ;;  %2615 = vrcp.f32 %v770_v11 }
 0x68b   :  { %v527_v16 = vmul.f32 %v2610_v12, %v2594_v51  ;;  %2617 = vrcp.f32 %v773_v10  ;;  %v655_v19 = vpop.permute.xlu1 %654  ;;  %v2202_v10 = vld [vmem:[%s3538_s10] ss:$0 sm:$0xff] }
 0x68d   :  { %v528_v17 = vpack.c.bf16 %v527_v16, %v526_v15  ;;  %v780_v28 = vpop.permute.xlu0 %779 }
 0x68e   :  { %v2612_v18 = vpop.eup %2611 }
 0x68f   :  { %2374 = vmatmul.mubr.msk.bf16.vlgmr.msra.gmra.mrb[8].mxu0 %vm380_vm13, %v528_v17  ;;  %v652_v22 = vmul.f32 %v2612_v18, %v2596_v52 }
 0x690   :  { %v2614_v20 = vpop.eup %2613  ;;  %2384 = vmatpush3.bf16.msra.mxu0 %v655_v19  ;;  %2385 = vmatprep.mubr.msk.bf16.mxu0 %vm2782_vm6, %v2781_v2 }
 0x691   :  { %v651_v21 = vmul.f32 %v2614_v20, %v2598_v53  ;;  %2395 = vmatprep.subr.bf16.mxu0 %v2781_v2 }
 0x693   :  { %v653_v26 = vpack.c.bf16 %v652_v22, %v651_v21 }
 0x694   :  { %v2616_v27 = vpop.eup %2615 }
 0x695   :  { %v2618_v29 = vpop.eup %2617  ;;  %v776_v30 = vmul.f32 %v2616_v27, %v2602_v57 }
 0x696   :  { %v777_v31 = vmul.f32 %v2618_v29, %v3125_v55 }
 0x697   :  { %2386 = vmatmul.mubr.msk.bf16.vlgmr.msra.gmra.mrb[12].mxu0 %vm380_vm13, %v653_v26 }
 0x698   :  { %2396 = vmatpush3.bf16.msra.mxu0 %v780_v28  ;;  %2397 = vmatprep.mubr.msk.bf16.mxu0 %vm2782_vm6, %v2781_v2  ;;  %v778_v32 = vpack.c.bf16 %v777_v31, %v776_v30 }
 0x699   :  { %2409 = vmatprep.subr.bf16.mxu0 %v2781_v2 }
 0x69f   :  { %2398 = vmatmul.mubr.msk.bf16.vlgmr.msra.gmra.mrb[16].mxu0 %vm380_vm13, %v778_v32 }
 0x6a0   :  { %2413 = vmatprep.mubr.msk.bf16.mxu0 %vm2782_vm6, %v2781_v2 }
 0x72d   :  { %v444_v33 = vpop.f32.mrb[4].mxu0 }
 0x72e   :  { %v2363_v34 = vpop.f32.mrb[5].mxu0 }
 0x72f   :  { %v447_v35 = vpop.f32.mrb[6].mxu0 }
 0x730   :  { %v2364_v36 = vpop.f32.mrb[7].mxu0 }
 0x762   :  { %v569_v37 = vpop.f32.mrb[8].mxu0 }
 0x763   :  { %v2375_v39 = vpop.f32.mrb[9].mxu0 }
 0x764   :  { %v572_v40 = vpop.f32.mrb[10].mxu0  ;;  %v964_v39 = vld [vmem:[%s3541_s13 + $0x18] sm:$0xff] }
 0x765   :  { %v2553_v44 = vpack.i.bf16 %v572_v40, %v569_v37  ;;  %v2376_v45 = vpop.f32.mrb[11].mxu0  ;;  %v963_v37 = vld [vmem:[%s3541_s13 + $0x10] sm:$0xff] }
 0x766   :  { %v967_v40 = vpack.c.bf16 %v964_v39, %v963_v37 }
 0x767   :  { %2554 = vrot.lane.b32.xlu1 %v2553_v44, %s3560_s30 }
 0x76a   :  { %v694_v47 = vpop.f32.mrb[12].mxu0 }
 0x76b   :  { %v2387_v49 = vpop.f32.mrb[13].mxu0 }
 0x76c   :  { %v697_v51 = vpop.f32.mrb[14].mxu0  ;;  %v2204_v49 = vld [vmem:[%s3539_s11] ss:$0 sm:$0xff] }
 0x76d   :  { %v2558_v25 = vpack.i.bf16 %v697_v51, %v694_v47  ;;  %v2388_v52 = vpop.f32.mrb[15].mxu0 }
 0x76e   :  { %v2205_v52 = vld [vmem:[%s3540_s12] ss:$0 sm:$0xff] }
 0x76f   :  { %2559 = vrot.lane.b32.xlu0 %v2558_v25, %s3559_s7 }
 0x772   :  { %v819_v53 = vpop.f32.mrb[16].mxu0 }
 0x773   :  { %v2399_v54 = vpop.f32.mrb[17].mxu0 }
 0x774   :  { %v822_v55 = vpop.f32.mrb[18].mxu0 }
 0x775   :  { %v2563_v56 = vpack.i.bf16 %v822_v55, %v819_v53  ;;  %v2400_v57 = vpop.f32.mrb[19].mxu0 }
 0x776   :  { %v1037_v57 = vld [vmem:[%s3543_s15] sm:$0xff] }
 0x777   :  { %2564 = vrot.lane.b32.xlu1 %v2563_v56, %s3558_s27  ;;  %s3588_s27 = smov 24  }
 0x7d9   :  { %v2555_v58 = vpop.permute.xlu1 %2554 }
 0x7da   :  { %v2557_v60 = vunpack.i.h.bf16 %v2555_v58  ;;  %v2556_v61 = vunpack.i.l.bf16 %v2555_v58  ;;  %v1038_v58 = vld [vmem:[%s3543_s15 + $0x8] sm:$0xff] }
 0x7dc   :  { %v851_v1 = vsel %vm328_vm12, %v447_v35, %v2557_v60  ;;  %v850_v3 = vsel %vm328_vm12, %v444_v33, %v2556_v61  ;;  %v962_v35 = vld [vmem:[%s3541_s13 + $0x8] sm:$0xff]  ;;  %v1046_v60 = vpack.c.bf16 %v1038_v58, %v1037_v57  ;;  %v1040_v61 = vld [vmem:[%s3543_s15 + $0x18] sm:$0xff]  ;;  %v2214_v58 = vld [vmem:[%s3582_s1 + $0x30] sm:$0xff] }
 0x7e1   :  { %v2560_v59 = vpop.permute.xlu0 %2559 }
 0x7e2   :  { %v2562_v62 = vunpack.i.h.bf16 %v2560_v59  ;;  %v2561_v63 = vunpack.i.l.bf16 %v2560_v59  ;;  %v1039_v59 = vld [vmem:[%s3543_s15 + $0x10] sm:$0xff] }
 0x7e4   :  { %v853_v6 = vsel %vm380_vm13, %v851_v1, %v2562_v62  ;;  %v852_v24 = vsel %vm380_vm13, %v850_v3, %v2561_v63  ;;  %v1047_v62 = vpack.c.bf16 %v1040_v61, %v1039_v59  ;;  %v1041_v63 = vld [vmem:[%s3543_s15 + $0x20] sm:$0xff]  ;;  %v1043_v3 = vld [vmem:[%s3543_s15 + $0x30] sm:$0xff]  ;;  %v2215_v59 = vld [vmem:[%s3582_s1 + $0x38] sm:$0xff] }
 0x7e9   :  { %v2565_v0 = vpop.permute.xlu1 %2564 }
 0x7ea   :  { %v2567_v4 = vunpack.i.h.bf16 %v2565_v0  ;;  %v2566_v5 = vunpack.i.l.bf16 %v2565_v0  ;;  %v1042_v0 = vld [vmem:[%s3543_s15 + $0x28] sm:$0xff] }
 0x7eb   :  { %v1048_v1 = vpack.c.bf16 %v1042_v0, %v1041_v63 }
 0x7ec   :  { %v856_v7 = vsel %vm854_vm14, %v853_v6, %v2567_v4  ;;  %v855_v8 = vsel %vm854_vm14, %v852_v24, %v2566_v5  ;;  %v1044_v4 = vld [vmem:[%s3543_s15 + $0x38] sm:$0xff]  ;;  %v2206_v6 = vld [vmem:[#allocation5] ss:$0 sm:$0xff] }
 0x7ed   :  { %v861_v9 = vpack.c.bf16 %v856_v7, %v855_v8  ;;  %v1049_v5 = vpack.c.bf16 %v1044_v4, %v1043_v3 }
 0x7ef   :  { %2406 = vmatmul.mubr.msk.bf16.vlgmr.msra.gmra.mrb[20].mxu1 %vm202_vm11, %v861_v9 }
 0x7f0   :  { %2425 = vmatprep.mubr.msk.bf16.mxu1 %vm2782_vm6, %v2781_v2  ;;  %2418 = vmatpush3.bf16.msra.mxu1 %v1046_v60  ;;  %v1155_v60 = vpack.c.bf16 %v2215_v59, %v2214_v58 }
 0x7f1   :  { %2419 = vmatprep.subr.bf16.mxu1 %v2781_v2 }
 0x7f4   :  { %2420 = vmatpush3.bf16.msra.mxu1 %v1047_v62 }
 0x7f5   :  { %2421 = vmatprep.subr.bf16.mxu1 %v2781_v2 }
 0x7f8   :  { %2422 = vmatpush3.bf16.msra.mxu1 %v1048_v1 }
 0x7f9   :  { %2423 = vmatprep.subr.bf16.mxu1 %v2781_v2 }
 0x7fc   :  { %2424 = vmatpush3.bf16.msra.mxu1 %v1049_v5  ;;  %v2210_v5 = vld [vmem:[%s3545_s17] ss:$0 sm:$0xff] }
 0x7fd   :  { %2443 = vmatprep.subr.bf16.mxu1 %v2781_v2 }
 0x8c2   :  { %v908_v11 = vpop.f32.mrb[20].mxu1 }
 0x8c3   :  { %v909_v12 = vadd.f32 %v2202_v10, %v908_v11  ;;  %v2407_v15 = vpop.f32.mrb[21].mxu1 }
 0x8c4   :  { %v911_v16 = vpop.f32.mrb[22].mxu1 }
 0x8c5   :  { %v912_v17 = vadd.f32 %v2202_v10, %v911_v16  ;;  %v2408_v18 = vpop.f32.mrb[23].mxu1  ;;  %v915_v19 = vadd.f32 %v909_v12, %v3040_v13 }
 0x8c7   :  { %v919_v20 = vsel %vm202_vm11, %v915_v19, 0.0  ;;  %v916_v21 = vadd.f32 %v912_v17, %v3042_v14  ;;  %v961_v14 = vld [vmem:[%s3541_s13] sm:$0xff] }
 0x8c8   :  { %920 = vadd.xlane.f32.xlu0 %v919_v20  ;;  %v966_v36 = vpack.c.bf16 %v962_v35, %v961_v14  ;;  %v2208_v14 = vld [vmem:[#allocation7] ss:$0 sm:$0xff] }
 0x8c9   :  { %v922_v22 = vsel %vm202_vm11, %v916_v21, 0.0 }
 0x8ca   :  { %923 = vadd.xlane.f32.xlu1 %v922_v22  ;;  %2410 = vmatpush3.bf16.msra.mxu0 %v966_v36 }
 0x8cb   :  { %2411 = vmatprep.subr.bf16.mxu0 %v2781_v2 }
 0x8ce   :  { %2412 = vmatpush3.bf16.msra.mxu0 %v967_v40 }
 0x8cf   :  { %2429 = vmatprep.subr.bf16.mxu0 %v2781_v2 }
 0x955   :  { %v921_v26 = vpop.xlane.xlu0 %920 }
 0x956   :  { %v925_v27 = vmul.f32 0.03125, %v921_v26 }
 0x957   :  { %v924_v28 = vpop.xlane.xlu1 %923 }
 0x958   :  { %v927_v29 = vsub.f32 %v915_v19, %v925_v27  ;;  %v926_v30 = vmul.f32 0.03125, %v924_v28 }
 0x95a   :  { %v928_v31 = vsub.f32 %v916_v21, %v926_v30  ;;  %v929_v32 = vmul.f32 %v927_v29, %v927_v29 }
 0x95c   :  { %v931_v33 = vsel %vm202_vm11, %v929_v32, 0.0  ;;  %v930_v34 = vmul.f32 %v928_v31, %v928_v31 }
 0x95d   :  { %932 = vadd.xlane.f32.xlu0 %v931_v33 }
 0x95e   :  { %v934_v13 = vsel %vm202_vm11, %v930_v34, 0.0 }
 0x961   :  { %935 = vadd.xlane.f32.xlu0 %v934_v13 }
 0x9ea   :  { %v933_v41 = vpop.xlane.xlu0 %932 }
 0x9eb   :  { %v937_v43 = vmul.f32 0.03125, %v933_v41 }
 0x9ed   :  { %v939_v44 = vadd.f32 1e-12, %v937_v43 }
 0x9ee   :  { %v936_v45 = vpop.xlane.xlu0 %935 }
 0x9ef   :  { %2619 = vrsqrt.f32 %v939_v44  ;;  %v938_v46 = vmul.f32 0.03125, %v936_v45 }
 0x9f1   :  { %v940_v47 = vadd.f32 1e-12, %v938_v46 }
 0x9f3   :  { %2621 = vrsqrt.f32 %v940_v47 }
 0x9f9   :  { %v2620_v48 = vpop.eup %2619 }
 0x9fa   :  { %v943_v23 = vmul.f32 %v2620_v48, %v927_v29 }
 0x9fc   :  { %v951_v51 = vmul.f32 %v2204_v49, %v943_v23 }
 0x9fd   :  { %v2622_v50 = vpop.eup %2621 }
 0x9fe   :  { %v944_v25 = vmul.f32 %v2622_v50, %v928_v31  ;;  %v3208_v54 = vadd.f32 %v2205_v52, %v951_v51 }
 0xa00   :  { %v952_v53 = vmul.f32 %v2204_v49, %v944_v25 }
 0xa02   :  { %v3210_v55 = vadd.f32 %v2205_v52, %v952_v53 }
 0xa04   :  { %v965_v56 = vpack.c.bf16 %v3210_v55, %v3208_v54 }
 0xa06   :  { %2414 = vmatmul.mubr.msk.bf16.vlgmr.msra.gmra.mrb[20].mxu0 %vm202_vm11, %v965_v56  ;;  %v2213_v56 = vld [vmem:[%s3582_s1 + $0x28] sm:$0xff] }
 0xa07   :  { %2433 = vmatprep.mubr.msk.bf16.mxu0 %vm2782_vm6, %v2781_v2 }
 0xad9   :  { %v1012_v24 = vpop.f32.mrb[20].mxu0 }
 0xada   :  { %v1013_v7 = vadd.f32 %v2206_v6, %v1012_v24  ;;  %v2415_v8 = vpop.f32.mrb[21].mxu0 }
 0xadb   :  { %v1015_v9 = vpop.f32.mrb[22].mxu0 }
 0xadc   :  { %v1021_v10 = vmul.f32 0.044715, %v1013_v7  ;;  %v1016_v11 = vadd.f32 %v2206_v6, %v1015_v9  ;;  %v2416_v12 = vpop.f32.mrb[23].mxu0  ;;  %v1019_v30 = vmul.f32 0.5, %v1013_v7  ;;  %v2211_v9 = vld [vmem:[%s3546_s18] ss:$0 sm:$0xff] }
 0xade   :  { %v1023_v15 = vmul.f32 %v1021_v10, %v1013_v7  ;;  %v1022_v16 = vmul.f32 0.044715, %v1016_v11  ;;  %v1020_v31 = vmul.f32 0.5, %v1016_v11 }
 0xae0   :  { %v1025_v17 = vmul.f32 %v1023_v15, %v1013_v7  ;;  %v1024_v18 = vmul.f32 %v1022_v16, %v1016_v11  ;;  %v2217_v16 = vld [vmem:[%s3536_s8 + $0x1] ss:$0 sm:$0xff]  ;;  %s3584_s8 = smov 48  }
 0xae2   :  { %v1027_v19 = vadd.f32 %v1025_v17, %v1013_v7  ;;  %v1026_v20 = vmul.f32 %v1024_v18, %v1016_v11 }
 0xae4   :  { %v1029_v21 = vmul.f32 0.7978846, %v1027_v19  ;;  %v1028_v22 = vadd.f32 %v1026_v20, %v1016_v11 }
 0xae6   :  { %2623 = vtanh.f32 %v1029_v21  ;;  %v1030_v26 = vmul.f32 0.7978846, %v1028_v22 }
 0xae8   :  { %2625 = vtanh.f32 %v1030_v26 }
 0xaf0   :  { %v2624_v27 = vpop.eup %2623 }
 0xaf1   :  { %v1033_v28 = vadd.f32 1.0, %v2624_v27 }
 0xaf2   :  { %v2626_v29 = vpop.eup %2625 }
 0xaf3   :  { %v1034_v32 = vadd.f32 1.0, %v2626_v29  ;;  %v1035_v33 = vmul.f32 %v1033_v28, %v1019_v30 }
 0xaf5   :  { %v1036_v34 = vmul.f32 %v1034_v32, %v1020_v31 }
 0xaf7   :  { %v1045_v13 = vpack.c.bf16 %v1036_v34, %v1035_v33 }
 0xaf9   :  { %2426 = vmatmul.mubr.msk.bf16.vlgmr.msra.gmra.mrb[24].mxu1 %vm1057_vm15, %v1045_v13 }
 0xafa   :  { %2445 = vmatprep.mubr.msk.bf16.mxu1 %vm2782_vm6, %v2781_v2 }
 0xbcc   :  { %v1095_v35 = vpop.f32.mrb[24].mxu1 }
 0xbcd   :  { %v1096_v36 = vadd.f32 %v2208_v14, %v1095_v35  ;;  %v2427_v37 = vpop.f32.mrb[25].mxu1 }
 0xbce   :  { %v1098_v39 = vpop.f32.mrb[26].mxu1 }
 0xbcf   :  { %v1099_v40 = vadd.f32 %v2208_v14, %v1098_v39  ;;  %v2428_v41 = vpop.f32.mrb[27].mxu1  ;;  %v1102_v43 = vadd.f32 %v1096_v36, %v3208_v54 }
 0xbd1   :  { %v1106_v44 = vsel %vm202_vm11, %v1102_v43, 0.0  ;;  %v1103_v45 = vadd.f32 %v1099_v40, %v3210_v55  ;;  %v2212_v55 = vld [vmem:[%s3582_s1 + $0x20] sm:$0xff] }
 0xbd2   :  { %1107 = vadd.xlane.f32.xlu1 %v1106_v44  ;;  %v1154_v57 = vpack.c.bf16 %v2213_v56, %v2212_v55 }
 0xbd3   :  { %v1109_v46 = vsel %vm202_vm11, %v1103_v45, 0.0 }
 0xbd4   :  { %1110 = vadd.xlane.f32.xlu0 %v1109_v46  ;;  %2430 = vmatpush3.bf16.msra.mxu0 %v1154_v57 }
 0xbd5   :  { %2431 = vmatprep.subr.bf16.mxu0 %v2781_v2 }
 0xbd8   :  { %2432 = vmatpush3.bf16.msra.mxu0 %v1155_v60 }
 0xbd9   :  { %2437 = vmatprep.subr.bf16.mxu0 %v2781_v2 }
 0xc5f   :  { %v1108_v47 = vpop.xlane.xlu1 %1107 }
 0xc60   :  { %v1112_v48 = vmul.f32 0.03125, %v1108_v47 }
 0xc61   :  { %v1111_v23 = vpop.xlane.xlu0 %1110 }
 0xc62   :  { %v1114_v49 = vsub.f32 %v1102_v43, %v1112_v48  ;;  %v1113_v50 = vmul.f32 0.03125, %v1111_v23 }
 0xc64   :  { %v1115_v51 = vsub.f32 %v1103_v45, %v1113_v50  ;;  %v1116_v25 = vmul.f32 %v1114_v49, %v1114_v49 }
 0xc66   :  { %v1118_v52 = vsel %vm202_vm11, %v1116_v25, 0.0  ;;  %v1117_v53 = vmul.f32 %v1115_v51, %v1115_v51 }
 0xc67   :  { %1119 = vadd.xlane.f32.xlu1 %v1118_v52 }
 0xc68   :  { %v1121_v54 = vsel %vm202_vm11, %v1117_v53, 0.0 }
 0xc69   :  { %1122 = vadd.xlane.f32.xlu0 %v1121_v54 }
 0xcf4   :  { %v1120_v61 = vpop.xlane.xlu1 %1119 }
 0xcf5   :  { %v1124_v62 = vmul.f32 0.03125, %v1120_v61 }
 0xcf6   :  { %v1123_v63 = vpop.xlane.xlu0 %1122 }
 0xcf7   :  { %v1126_v0 = vadd.f32 1e-12, %v1124_v62  ;;  %v1125_v1 = vmul.f32 0.03125, %v1123_v63 }
 0xcf9   :  { %2627 = vrsqrt.f32 %v1126_v0  ;;  %v1127_v3 = vadd.f32 1e-12, %v1125_v1 }
 0xcfb   :  { %2629 = vrsqrt.f32 %v1127_v3 }
 0xd03   :  { %v2628_v4 = vpop.eup %2627 }
 0xd04   :  { %v1130_v6 = vmul.f32 %v2628_v4, %v1114_v49 }
 0xd05   :  { %v2630_v24 = vpop.eup %2629 }
 0xd06   :  { %v1138_v7 = vmul.f32 %v2210_v5, %v1130_v6  ;;  %v1131_v8 = vmul.f32 %v2630_v24, %v1115_v51 }
 0xd08   :  { %v1139_v10 = vmul.f32 %v2210_v5, %v1131_v8  ;;  %v3274_v11 = vadd.f32 %v2211_v9, %v1138_v7 }
 0xd0a   :  { %v3276_v12 = vadd.f32 %v2211_v9, %v1139_v10 }
 0xd0c   :  { %v1153_v15 = vpack.c.bf16 %v3276_v12, %v3274_v11 }
 0xd0e   :  { %2434 = vmatmul.mubr.msk.bf16.vlgmr.msra.gmra.mrb[24].mxu0 %vm202_vm11, %v1153_v15 }
 0xd0f   :  { %2439 = vmatprep.mubr.msk.bf16.mxu0 %vm2782_vm6, %v2781_v2 }
 0xde1   :  { %v1201_v17 = vpop.f32.mrb[24].mxu0 }
 0xde2   :  { %v2435_v18 = vpop.f32.mrb[25].mxu0  ;;  %v1202_v20 = vadd.f32 %v2217_v16, %v1201_v17 }
 0xde3   :  { %v1204_v19 = vpop.f32.mrb[26].mxu0 }
 0xde4   :  { %v1205_v21 = vadd.f32 %v2217_v16, %v1204_v19  ;;  %v2436_v22 = vpop.f32.mrb[27].mxu0 }
 0xde6   :  { %v3286_v26 = vpack.c.bf16 %v1205_v21, %v1202_v20 }
 0xde8   :  { %1335 = vrot.lane.b32.xlu0 %v3286_v26, %s2785_s24  ;;  %1210 = vrot.lane.b32.xlu1 %v3286_v26, %s2784_s0 }
 0xdec   :  { %1458 = vrot.lane.b32.xlu0 %v3286_v26, %s2783_s3  ;;  %1333 = vrot.lane.b32.xlu1 %v3286_v26, %s2786_s22  ;;  %s3585_s3 = smov 40  }
 0xdf0   :  { %1583 = vrot.lane.b32.xlu0 %v3286_v26, %s2789_s2  ;;  %1460 = vrot.lane.b32.xlu1 %v3286_v26, %s2787_s23 }
 0xdf4   :  { %1585 = vrot.lane.b32.xlu1 %v3286_v26, %s2788_s5  ;;  %s3586_s5 = smov 8  }
 0xe5a   :  { %v1211_v27 = vpop.permute.xlu1 %1210  ;;  %v1336_v29 = vpop.permute.xlu0 %1335 }
 0xe5b   :  { %v1216_v28 = vsel %vm328_vm12, %v1211_v27, 0  ;;  %v1341_v31 = vsel %vm328_vm12, %v1336_v29, 0 }
 0xe5c   :  { %2438 = vmatpush3.bf16.xpose.msra.mxu0 %v1216_v28 }
 0xe5d   :  { %2449 = vmatprep.subr.bf16.mxu0 %v2781_v2 }
 0xe5e   :  { %v1334_v30 = vpop.permute.xlu1 %1333  ;;  %v1459_v13 = vpop.permute.xlu0 %1458 }
 0xe62   :  { %v1461_v32 = vpop.permute.xlu1 %1460  ;;  %v1584_v35 = vpop.permute.xlu0 %1583 }
 0xe63   :  { %2440 = vmatmul.mubr.msk.bf16.vlgmr.msra.gmra.mrb[28].mxu0 %vm328_vm12, %v3286_v26  ;;  %v1466_v33 = vsel %vm328_vm12, %v1461_v32, 0 }
 0xe64   :  { %2450 = vmatpush3.bf16.xpose.msra.mxu0 %v1341_v31  ;;  %2451 = vmatprep.mubr.msk.bf16.mxu0 %vm2782_vm6, %v2781_v2 }
 0xe65   :  { %2461 = vmatprep.subr.bf16.mxu0 %v2781_v2 }
 0xe66   :  { %v1586_v34 = vpop.permute.xlu1 %1585 }
 0xe67   :  { %v1591_v14 = vsel %vm328_vm12, %v1586_v34, 0 }
 0xe6b   :  { %2452 = vmatmul.mubr.msk.bf16.vlgmr.msra.gmra.mrb[32].mxu0 %vm328_vm12, %v1334_v30 }
 0xe6c   :  { %2462 = vmatpush3.bf16.xpose.msra.mxu0 %v1466_v33  ;;  %2463 = vmatprep.mubr.msk.bf16.mxu0 %vm2782_vm6, %v2781_v2 }
 0xe6d   :  { %2473 = vmatprep.subr.bf16.mxu0 %v2781_v2 }
 0xe73   :  { %2464 = vmatmul.mubr.msk.bf16.vlgmr.msra.gmra.mrb[36].mxu0 %vm328_vm12, %v1459_v13 }
 0xe74   :  { %2474 = vmatpush3.bf16.xpose.msra.mxu0 %v1591_v14  ;;  %2475 = vmatprep.mubr.msk.bf16.mxu0 %vm2782_vm6, %v2781_v2 }
 0xe75   :  { %2485 = vmatprep.subr.bf16.mxu0 %v2781_v2 }
 0xe7b   :  { %2476 = vmatmul.mubr.msk.bf16.vlgmr.msra.gmra.mrb[40].mxu0 %vm328_vm12, %v1584_v35 }
 0xe7c   :  { %2489 = vmatprep.mubr.msk.bf16.mxu0 %vm2782_vm6, %v2781_v2 }
 0xf36   :  { %v1252_v36 = vpop.f32.mrb[28].mxu0 }
 0xf37   :  { %v1259_v37 = vmul.f32 0.35355338, %v1252_v36  ;;  %v2441_v39 = vpop.f32.mrb[29].mxu0 }
 0xf38   :  { %v1255_v40 = vpop.f32.mrb[30].mxu0 }
 0xf39   :  { %v1260_v41 = vmul.f32 0.35355338, %v1255_v40  ;;  %v2442_v43 = vpop.f32.mrb[31].mxu0  ;;  %v1261_v44 = vadd.f32 %v1259_v37, %v3091_v38 }
 0xf3b   :  { %v1263_v45 = vsel %vm380_vm13, %v1261_v44, -inf  ;;  %v1262_v46 = vadd.f32 %v1260_v41, %v3095_v42 }
 0xf3c   :  { %1264 = vmax.xlane.f32.xlu1 %v1263_v45 }
 0xf3d   :  { %v1266_v47 = vsel %vm380_vm13, %v1262_v46, -inf }
 0xf3e   :  { %1267 = vmax.xlane.f32.xlu0 %v1266_v47  ;;  %v1377_v48 = vpop.f32.mrb[32].mxu0 }
 0xf3f   :  { %v1384_v23 = vmul.f32 0.35355338, %v1377_v48  ;;  %v2453_v49 = vpop.f32.mrb[33].mxu0 }
 0xf40   :  { %v1380_v50 = vpop.f32.mrb[34].mxu0 }
 0xf41   :  { %v1385_v51 = vmul.f32 0.35355338, %v1380_v50  ;;  %v2454_v25 = vpop.f32.mrb[35].mxu0  ;;  %v1386_v52 = vadd.f32 %v1384_v23, %v3091_v38 }
 0xf43   :  { %v1388_v53 = vsel %vm380_vm13, %v1386_v52, -inf  ;;  %v1387_v54 = vadd.f32 %v1385_v51, %v3095_v42 }
 0xf44   :  { %1389 = vmax.xlane.f32.xlu0 %v1388_v53 }
 0xf45   :  { %v1391_v55 = vsel %vm380_vm13, %v1387_v54, -inf }
 0xf46   :  { %1392 = vmax.xlane.f32.xlu1 %v1391_v55  ;;  %v1502_v56 = vpop.f32.mrb[36].mxu0 }
 0xf47   :  { %v1509_v57 = vmul.f32 0.35355338, %v1502_v56  ;;  %v2465_v58 = vpop.f32.mrb[37].mxu0 }
 0xf48   :  { %v1505_v59 = vpop.f32.mrb[38].mxu0 }
 0xf49   :  { %v1510_v60 = vmul.f32 0.35355338, %v1505_v59  ;;  %v2466_v61 = vpop.f32.mrb[39].mxu0  ;;  %v1511_v62 = vadd.f32 %v1509_v57, %v3091_v38 }
 0xf4b   :  { %v1513_v63 = vsel %vm380_vm13, %v1511_v62, -inf  ;;  %v1512_v0 = vadd.f32 %v1510_v60, %v3095_v42 }
 0xf4c   :  { %1514 = vmax.xlane.f32.xlu0 %v1513_v63 }
 0xf4d   :  { %v1516_v1 = vsel %vm380_vm13, %v1512_v0, -inf }
 0xf4e   :  { %1517 = vmax.xlane.f32.xlu1 %v1516_v1  ;;  %v1627_v3 = vpop.f32.mrb[40].mxu0 }
 0xf4f   :  { %v1634_v4 = vmul.f32 0.35355338, %v1627_v3  ;;  %v2477_v5 = vpop.f32.mrb[41].mxu0 }
 0xf50   :  { %v1630_v6 = vpop.f32.mrb[42].mxu0 }
 0xf51   :  { %v1635_v24 = vmul.f32 0.35355338, %v1630_v6  ;;  %v2478_v7 = vpop.f32.mrb[43].mxu0  ;;  %v1636_v8 = vadd.f32 %v1634_v4, %v3091_v38 }
 0xf53   :  { %v1638_v9 = vsel %vm380_vm13, %v1636_v8, -inf  ;;  %v1637_v10 = vadd.f32 %v1635_v24, %v3095_v42 }
 0xf54   :  { %1639 = vmax.xlane.f32.xlu0 %v1638_v9 }
 0xf55   :  { %v1641_v15 = vsel %vm380_vm13, %v1637_v10, -inf }
 0xf56   :  { %1642 = vmax.xlane.f32.xlu1 %v1641_v15 }
 0xfc9   :  { %v1265_v16 = vpop.xlane.xlu1 %1264 }
 0xfca   :  { %v1269_v17 = vsub.f32 %v1261_v44, %v1265_v16 }
 0xfcb   :  { %v1268_v18 = vpop.xlane.xlu0 %1267 }
 0xfcc   :  { %v1271_v19 = vmul.f32 1.442695, %v1269_v17  ;;  %v1270_v20 = vsub.f32 %v1262_v46, %v1268_v18 }
 0xfce   :  { %2631 = vpow2.f32 %v1271_v19  ;;  %v1273_v21 = vmul.f32 1.442695, %v1270_v20 }
 0xfd0   :  { %2633 = vpow2.f32 %v1273_v21 }
 0xfd1   :  { %v1390_v22 = vpop.xlane.xlu0 %1389 }
 0xfd2   :  { %v1394_v27 = vsub.f32 %v1386_v52, %v1390_v22 }
 0xfd3   :  { %v1393_v33 = vpop.xlane.xlu1 %1392 }
 0xfd4   :  { %v1396_v28 = vmul.f32 1.442695, %v1394_v27  ;;  %v1395_v34 = vsub.f32 %v1387_v54, %v1393_v33 }
 0xfd6   :  { %2635 = vpow2.f32 %v1396_v28  ;;  %v1398_v35 = vmul.f32 1.442695, %v1395_v34 }
 0xfd8   :  { %v2632_v38 = vpop.eup %2631  ;;  %2637 = vpow2.f32 %v1398_v35  ;;  %v2228_v35 = vld [vmem:[%s3537_s9 + $0x28] sm:$0xff] }
 0xfd9   :  { %v1275_v29 = vsel %vm380_vm13, %v2632_v38, 0.0  ;;  %v1515_v14 = vpop.xlane.xlu0 %1514 }
 0xfda   :  { %v2634_v42 = vpop.eup %2633  ;;  %1276 = vadd.xlane.f32.xlu0 %v1275_v29  ;;  %v1519_v39 = vsub.f32 %v1511_v62, %v1515_v14  ;;  %v2227_v14 = vld [vmem:[%s3537_s9 + $0x20] sm:$0xff] }
 0xfdb   :  { %v1278_v30 = vsel %vm380_vm13, %v2634_v42, 0.0  ;;  %v1518_v13 = vpop.xlane.xlu1 %1517 }
 0xfdc   :  { %1279 = vadd.xlane.f32.xlu1 %v1278_v30  ;;  %v1520_v36 = vsub.f32 %v1512_v0, %v1518_v13  ;;  %v1521_v44 = vmul.f32 1.442695, %v1519_v39  ;;  %v1744_v39 = vpack.c.bf16 %v2228_v35, %v2227_v14 }
 0xfde   :  { %v1523_v41 = vmul.f32 1.442695, %v1520_v36  ;;  %2486 = vmatpush3.bf16.msra.mxu0 %v1744_v39 }
 0xfdf   :  { %2487 = vmatprep.subr.bf16.mxu0 %v2781_v2 }
 0xfe0   :  { %v3341_v31 = vpop.eup %2635  ;;  %2639 = vpow2.f32 %v1523_v41  ;;  %v2229_v41 = vld [vmem:[%s3537_s9 + $0x30] sm:$0xff] }
 0xfe1   :  { %v1400_v32 = vsel %vm380_vm13, %v3341_v31, 0.0  ;;  %v1640_v40 = vpop.xlane.xlu0 %1639  ;;  %2641 = vpow2.f32 %v1521_v44 }
 0xfe2   :  { %1401 = vadd.xlane.f32.xlu0 %v1400_v32  ;;  %v1644_v45 = vsub.f32 %v1636_v8, %v1640_v40  ;;  %v2638_v48 = vpop.eup %2637 }
 0xfe3   :  { %v1643_v37 = vpop.xlane.xlu1 %1642  ;;  %v1403_v23 = vsel %vm380_vm13, %v2638_v48, 0.0 }
 0xfe4   :  { %v1645_v43 = vsub.f32 %v1637_v10, %v1643_v37  ;;  %v1646_v47 = vmul.f32 1.442695, %v1644_v45 }
 0xfe6   :  { %v1648_v46 = vmul.f32 1.442695, %v1645_v43  ;;  %v2230_v43 = vld [vmem:[%s3537_s9 + $0x38] sm:$0xff]  ;;  %s3589_s9 = sld [smem:[#allocation20_spill]] }
 0xfe7   :  { %v1745_v45 = vpack.c.bf16 %v2230_v43, %v2229_v41  ;;  %v2236_v41 = vld [vmem:[%s3539_s11 + $0x1] ss:$0 sm:$0xff] }
 0xfe8   :  { %2643 = vpow2.f32 %v1648_v46 }
 0xfe9   :  { %2645 = vpow2.f32 %v1646_v47  ;;  %2488 = vmatpush3.bf16.msra.mxu0 %v1745_v45 }
 0xfea   :  { %v2640_v49 = vpop.eup %2639  ;;  %2501 = vmatprep.subr.bf16.mxu0 %v2781_v2 }
 0xfeb   :  { %v2642_v50 = vpop.eup %2641  ;;  %v1528_v51 = vsel %vm380_vm13, %v2640_v49, 0.0 }
 0xfec   :  { %v1525_v52 = vsel %vm380_vm13, %v2642_v50, 0.0 }
 0xfed   :  { %1411 = vrot.lane.b32.xlu1 %v3286_v26, %s2791_s6 }
 0xff2   :  { %v3351_v25 = vpop.eup %2643 }
 0xff3   :  { %v2646_v53 = vpop.eup %2645  ;;  %v1653_v54 = vsel %vm380_vm13, %v3351_v25, 0.0 }
 0xff4   :  { %v1650_v55 = vsel %vm380_vm13, %v2646_v53, 0.0 }
 0xff8   :  { %1286 = vrot.lane.b32.xlu0 %v3286_v26, %s2792_s4 }
0x1011   :  { %1404 = vadd.xlane.f32.xlu1 %v1403_v23 }
0x1015   :  { %1529 = vadd.xlane.f32.xlu1 %v1528_v51 }
0x1017   :  { %1526 = vadd.xlane.f32.xlu0 %v1525_v52 }
0x1019   :  { %1654 = vadd.xlane.f32.xlu1 %v1653_v54 }
0x101b   :  { %1651 = vadd.xlane.f32.xlu0 %v1650_v55 }
0x102a   :  { %1536 = vrot.lane.b32.xlu1 %v3286_v26, %s3584_s8 }
0x1031   :  { %1661 = vrot.lane.b32.xlu0 %v3286_v26, %s3585_s3 }
0x1067   :  { %v1277_v56 = vpop.xlane.xlu0 %1276 }
0x1068   :  { %2647 = vrcp.f32 %v1277_v56 }
0x1069   :  { %v1280_v57 = vpop.xlane.xlu1 %1279 }
0x106a   :  { %2649 = vrcp.f32 %v1280_v57 }
0x106d   :  { %v1412_v1 = vpop.permute.xlu1 %1411 }
0x106f   :  { %v1402_v58 = vpop.xlane.xlu0 %1401 }
0x1070   :  { %2651 = vrcp.f32 %v1402_v58 }
0x1072   :  { %v2648_v59 = vpop.eup %2647 }
0x1073   :  { %v1287_v60 = vpop.permute.xlu0 %1286  ;;  %v1283_v62 = vmul.f32 %v2648_v59, %v2632_v38 }
0x1074   :  { %v2650_v61 = vpop.eup %2649  ;;  %2444 = vmatpush3.bf16.msra.mxu1 %v1287_v60 }
0x1075   :  { %v1284_v63 = vmul.f32 %v2650_v61, %v2634_v42  ;;  %2455 = vmatprep.subr.bf16.mxu1 %v2781_v2 }
0x1077   :  { %v1285_v0 = vpack.c.bf16 %v1284_v63, %v1283_v62 }
0x1079   :  { %2446 = vmatmul.mubr.msk.bf16.vlgmr.msra.gmra.mrb[28].mxu1 %vm380_vm13, %v1285_v0 }
0x107a   :  { %2456 = vmatpush3.bf16.msra.mxu1 %v1412_v1  ;;  %2457 = vmatprep.mubr.msk.bf16.mxu1 %vm2782_vm6, %v2781_v2  ;;  %v2652_v5 = vpop.eup %2651 }
0x107b   :  { %2467 = vmatprep.subr.bf16.mxu1 %v2781_v2  ;;  %v1408_v8 = vmul.f32 %v2652_v5, %v3341_v31 }
0x109e   :  { %v1405_v26 = vpop.xlane.xlu1 %1404 }
0x109f   :  { %2653 = vrcp.f32 %v1405_v26 }
0x10a2   :  { %v1530_v3 = vpop.xlane.xlu1 %1529 }
0x10a3   :  { %2655 = vrcp.f32 %v1530_v3 }
0x10a4   :  { %v1527_v4 = vpop.xlane.xlu0 %1526 }
0x10a5   :  { %2657 = vrcp.f32 %v1527_v4  ;;  %v2232_v4 = vld [vmem:[%s3538_s10 + $0x1] ss:$0 sm:$0xff] }
0x10a6   :  { %v1655_v6 = vpop.xlane.xlu1 %1654 }
0x10a8   :  { %v1652_v24 = vpop.xlane.xlu0 %1651 }
0x10a9   :  { %v2654_v7 = vpop.eup %2653  ;;  %2659 = vrcp.f32 %v1652_v24 }
0x10aa   :  { %v1409_v9 = vmul.f32 %v2654_v7, %v2638_v48  ;;  %2661 = vrcp.f32 %v1655_v6  ;;  %v1537_v16 = vpop.permute.xlu1 %1536 }
0x10ac   :  { %v1410_v10 = vpack.c.bf16 %v1409_v9, %v1408_v8  ;;  %v1662_v22 = vpop.permute.xlu0 %1661 }
0x10ad   :  { %v2656_v15 = vpop.eup %2655 }
0x10ae   :  { %2458 = vmatmul.mubr.msk.bf16.vlgmr.msra.gmra.mrb[32].mxu1 %vm380_vm13, %v1410_v10  ;;  %v1534_v19 = vmul.f32 %v2656_v15, %v2640_v49 }
0x10af   :  { %v2658_v17 = vpop.eup %2657  ;;  %2468 = vmatpush3.bf16.msra.mxu1 %v1537_v16  ;;  %2469 = vmatprep.mubr.msk.bf16.mxu1 %vm2782_vm6, %v2781_v2 }
0x10b0   :  { %v1533_v18 = vmul.f32 %v2658_v17, %v2642_v50  ;;  %2479 = vmatprep.subr.bf16.mxu1 %v2781_v2 }
0x10b2   :  { %v1535_v20 = vpack.c.bf16 %v1534_v19, %v1533_v18 }
0x10b3   :  { %v2660_v21 = vpop.eup %2659 }
0x10b4   :  { %v2662_v27 = vpop.eup %2661  ;;  %v1658_v28 = vmul.f32 %v2660_v21, %v2646_v53 }
0x10b5   :  { %v1659_v38 = vmul.f32 %v2662_v27, %v3351_v25 }
0x10b6   :  { %2470 = vmatmul.mubr.msk.bf16.vlgmr.msra.gmra.mrb[36].mxu1 %vm380_vm13, %v1535_v20 }
0x10b7   :  { %2480 = vmatpush3.bf16.msra.mxu1 %v1662_v22  ;;  %2481 = vmatprep.mubr.msk.bf16.mxu1 %vm2782_vm6, %v2781_v2  ;;  %v1660_v29 = vpack.c.bf16 %v1659_v38, %v1658_v28 }
0x10b8   :  { %2493 = vmatprep.subr.bf16.mxu1 %v2781_v2 }
0x10be   :  { %2482 = vmatmul.mubr.msk.bf16.vlgmr.msra.gmra.mrb[40].mxu1 %vm380_vm13, %v1660_v29 }
0x10bf   :  { %2497 = vmatprep.mubr.msk.bf16.mxu1 %vm2782_vm6, %v2781_v2 }
0x114c   :  { %v1326_v42 = vpop.f32.mrb[28].mxu1 }
0x114d   :  { %v2447_v30 = vpop.f32.mrb[29].mxu1 }
0x114e   :  { %v1329_v31 = vpop.f32.mrb[30].mxu1 }
0x114f   :  { %v2448_v32 = vpop.f32.mrb[31].mxu1 }
0x1150   :  { %v2241_v32 = vld [vmem:[%s3541_s13 + $0x38] sm:$0xff] }
0x1181   :  { %v1451_v33 = vpop.f32.mrb[32].mxu1 }
0x1182   :  { %v2459_v34 = vpop.f32.mrb[33].mxu1 }
0x1183   :  { %v1454_v13 = vpop.f32.mrb[34].mxu1 }
0x1184   :  { %v2568_v36 = vpack.i.bf16 %v1454_v13, %v1451_v33  ;;  %v2460_v37 = vpop.f32.mrb[35].mxu1 }
0x1186   :  { %2569 = vrot.lane.b32.xlu1 %v2568_v36, %s3586_s5 }
0x1189   :  { %v1576_v40 = vpop.f32.mrb[36].mxu1 }
0x118a   :  { %v2471_v44 = vpop.f32.mrb[37].mxu1 }
0x118b   :  { %v1579_v46 = vpop.f32.mrb[38].mxu1 }
0x118c   :  { %v2573_v47 = vpack.i.bf16 %v1579_v46, %v1576_v40  ;;  %v2472_v48 = vpop.f32.mrb[39].mxu1  ;;  %v2237_v46 = vld [vmem:[%s3540_s12 + $0x1] ss:$0 sm:$0xff] }
0x118e   :  { %2574 = vrot.lane.b32.xlu0 %v2573_v47, %s3587_s14 }
0x1191   :  { %v1701_v23 = vpop.f32.mrb[40].mxu1 }
0x1192   :  { %v2483_v49 = vpop.f32.mrb[41].mxu1 }
0x1193   :  { %v1704_v50 = vpop.f32.mrb[42].mxu1 }
0x1194   :  { %v2578_v51 = vpack.i.bf16 %v1704_v50, %v1701_v23  ;;  %v2484_v25 = vpop.f32.mrb[43].mxu1  ;;  %v2244_v50 = vld [vmem:[%s3543_s15 + $0x40] sm:$0xff] }
0x1195   :  { %v2246_v25 = vld [vmem:[%s3543_s15 + $0x50] sm:$0xff] }
0x1196   :  { %2579 = vrot.lane.b32.xlu1 %v2578_v51, %s3588_s27  ;;  %v2245_v51 = vld [vmem:[%s3543_s15 + $0x48] sm:$0xff] }
0x11f8   :  { %v2570_v52 = vpop.permute.xlu1 %2569 }
0x11f9   :  { %v2572_v54 = vunpack.i.h.bf16 %v2570_v52  ;;  %v2571_v55 = vunpack.i.l.bf16 %v2570_v52  ;;  %v1934_v52 = vpack.c.bf16 %v2245_v51, %v2244_v50  ;;  %v2045_v50 = vld [vmem:[%s3547_s19 + $0x18] sm:$0xff] }
0x11fb   :  { %v1733_v59 = vsel %vm328_vm12, %v1329_v31, %v2572_v54  ;;  %v1732_v60 = vsel %vm328_vm12, %v1326_v42, %v2571_v55  ;;  %v2239_v42 = vld [vmem:[%s3541_s13 + $0x28] sm:$0xff]  ;;  %v2240_v31 = vld [vmem:[%s3541_s13 + $0x30] sm:$0xff]  ;;  %v2248_v55 = vld [vmem:[%s3543_s15 + $0x60] sm:$0xff] }
0x11fc   :  { %v1853_v33 = vpack.c.bf16 %v2241_v32, %v2240_v31 }
0x1200   :  { %v2575_v53 = vpop.permute.xlu0 %2574 }
0x1201   :  { %v2577_v56 = vunpack.i.h.bf16 %v2575_v53  ;;  %v2576_v57 = vunpack.i.l.bf16 %v2575_v53  ;;  %v2247_v53 = vld [vmem:[%s3543_s15 + $0x58] sm:$0xff] }
0x1202   :  { %v1935_v54 = vpack.c.bf16 %v2247_v53, %v2246_v25 }
0x1203   :  { %v1734_v63 = vsel %vm380_vm13, %v1732_v60, %v2576_v57  ;;  %v1735_v0 = vsel %vm380_vm13, %v1733_v59, %v2577_v56  ;;  %v2249_v56 = vld [vmem:[%s3543_s15 + $0x68] sm:$0xff]  ;;  %v2251_v59 = vld [vmem:[%s3543_s15 + $0x78] sm:$0xff] }
0x1204   :  { %v1936_v57 = vpack.c.bf16 %v2249_v56, %v2248_v55 }
0x1208   :  { %v2580_v58 = vpop.permute.xlu1 %2579 }
0x1209   :  { %v2582_v61 = vunpack.i.h.bf16 %v2580_v58  ;;  %v2581_v62 = vunpack.i.l.bf16 %v2580_v58  ;;  %v2250_v58 = vld [vmem:[%s3543_s15 + $0x70] sm:$0xff] }
0x120a   :  { %v1937_v60 = vpack.c.bf16 %v2251_v59, %v2250_v58 }
0x120b   :  { %v1736_v1 = vsel %vm854_vm14, %v1734_v63, %v2581_v62  ;;  %v1737_v26 = vsel %vm854_vm14, %v1735_v0, %v2582_v61  ;;  %v2242_v61 = vld [vmem:[#allocation5 + $0x1] ss:$0 sm:$0xff] }
0x120c   :  { %v1743_v3 = vpack.c.bf16 %v1737_v26, %v1736_v1 }
0x120e   :  { %2490 = vmatmul.mubr.msk.bf16.vlgmr.msra.gmra.mrb[44].mxu0 %vm202_vm11, %v1743_v3 }
0x120f   :  { %2509 = vmatprep.mubr.msk.bf16.mxu0 %vm2782_vm6, %v2781_v2  ;;  %2502 = vmatpush3.bf16.msra.mxu0 %v1934_v52 }
0x1210   :  { %2503 = vmatprep.subr.bf16.mxu0 %v2781_v2 }
0x1213   :  { %2504 = vmatpush3.bf16.msra.mxu0 %v1935_v54 }
0x1214   :  { %2505 = vmatprep.subr.bf16.mxu0 %v2781_v2 }
0x1217   :  { %2506 = vmatpush3.bf16.msra.mxu0 %v1936_v57 }
0x1218   :  { %2507 = vmatprep.subr.bf16.mxu0 %v2781_v2 }
0x121b   :  { %2508 = vmatpush3.bf16.msra.mxu0 %v1937_v60  ;;  %v2256_v60 = vld [vmem:[%s3545_s17 + $0x1] ss:$0 sm:$0xff] }
0x12e1   :  { %v1791_v5 = vpop.f32.mrb[44].mxu0 }
0x12e2   :  { %v1792_v6 = vadd.f32 %v2232_v4, %v1791_v5  ;;  %v2491_v24 = vpop.f32.mrb[45].mxu0 }
0x12e3   :  { %v1794_v7 = vpop.f32.mrb[46].mxu0 }
0x12e4   :  { %v1795_v8 = vadd.f32 %v2232_v4, %v1794_v7  ;;  %v2492_v9 = vpop.f32.mrb[47].mxu0  ;;  %v1798_v10 = vadd.f32 %v1792_v6, %v3274_v11 }
0x12e6   :  { %v1804_v15 = vsel %vm202_vm11, %v1798_v10, 0.0  ;;  %v1799_v16 = vadd.f32 %v1795_v8, %v3276_v12  ;;  %v2238_v12 = vld [vmem:[%s3541_s13 + $0x20] sm:$0xff] }
0x12e7   :  { %1805 = vadd.xlane.f32.xlu0 %v1804_v15  ;;  %v1852_v30 = vpack.c.bf16 %v2239_v42, %v2238_v12 }
0x12e8   :  { %v1807_v17 = vsel %vm202_vm11, %v1799_v16, 0.0 }
0x12e9   :  { %1808 = vadd.xlane.f32.xlu1 %v1807_v17  ;;  %2494 = vmatpush3.bf16.msra.mxu1 %v1852_v30 }
0x12ea   :  { %2495 = vmatprep.subr.bf16.mxu1 %v2781_v2 }
0x12ed   :  { %2496 = vmatpush3.bf16.msra.mxu1 %v1853_v33 }
0x12ee   :  { %2513 = vmatprep.subr.bf16.mxu1 %v2781_v2 }
0x1374   :  { %v1806_v18 = vpop.xlane.xlu0 %1805 }
0x1375   :  { %v1810_v19 = vmul.f32 0.03125, %v1806_v18 }
0x1376   :  { %v1809_v20 = vpop.xlane.xlu1 %1808 }
0x1377   :  { %v1812_v21 = vsub.f32 %v1798_v10, %v1810_v19  ;;  %v1811_v22 = vmul.f32 0.03125, %v1809_v20 }
0x1379   :  { %v1813_v27 = vsub.f32 %v1799_v16, %v1811_v22  ;;  %v1814_v28 = vmul.f32 %v1812_v21, %v1812_v21 }
0x137b   :  { %v1816_v38 = vsel %vm202_vm11, %v1814_v28, 0.0  ;;  %v1815_v29 = vmul.f32 %v1813_v27, %v1813_v27 }
0x137c   :  { %1817 = vadd.xlane.f32.xlu0 %v1816_v38 }
0x137d   :  { %v1819_v11 = vsel %vm202_vm11, %v1815_v29, 0.0  ;;  %v2252_v29 = vld [vmem:[#allocation7 + $0x1] ss:$0 sm:$0xff] }
0x1380   :  { %1820 = vadd.xlane.f32.xlu0 %v1819_v11 }
0x1409   :  { %v1818_v34 = vpop.xlane.xlu0 %1817 }
0x140a   :  { %v1822_v13 = vmul.f32 0.03125, %v1818_v34 }
0x140c   :  { %v1824_v14 = vadd.f32 1e-12, %v1822_v13 }
0x140d   :  { %v1821_v35 = vpop.xlane.xlu0 %1820 }
0x140e   :  { %2663 = vrsqrt.f32 %v1824_v14  ;;  %v1823_v36 = vmul.f32 0.03125, %v1821_v35 }
0x1410   :  { %v1825_v37 = vadd.f32 1e-12, %v1823_v36 }
0x1412   :  { %2665 = vrsqrt.f32 %v1825_v37 }
0x1418   :  { %v2664_v39 = vpop.eup %2663 }
0x1419   :  { %v1828_v40 = vmul.f32 %v2664_v39, %v1812_v21 }
0x141b   :  { %v1836_v44 = vmul.f32 %v2236_v41, %v1828_v40 }
0x141c   :  { %v2666_v43 = vpop.eup %2665 }
0x141d   :  { %v1829_v45 = vmul.f32 %v2666_v43, %v1813_v27  ;;  %v1844_v48 = vadd.f32 %v2237_v46, %v1836_v44 }
0x141f   :  { %v1837_v47 = vmul.f32 %v2236_v41, %v1829_v45 }
0x1421   :  { %v1845_v23 = vadd.f32 %v2237_v46, %v1837_v47  ;;  %v2042_v47 = vld [vmem:[%s3547_s19] sm:$0xff] }
0x1423   :  { %v1851_v49 = vpack.c.bf16 %v1845_v23, %v1844_v48 }
0x1425   :  { %2498 = vmatmul.mubr.msk.bf16.vlgmr.msra.gmra.mrb[44].mxu1 %vm202_vm11, %v1851_v49  ;;  %v2044_v49 = vld [vmem:[%s3547_s19 + $0x10] sm:$0xff] }
0x1426   :  { %2517 = vmatprep.mubr.msk.bf16.mxu1 %vm2782_vm6, %v2781_v2  ;;  %v2048_v51 = vpack.c.bf16 %v2045_v50, %v2044_v49 }
0x14f8   :  { %v1899_v62 = vpop.f32.mrb[44].mxu1 }
0x14f9   :  { %v1900_v63 = vadd.f32 %v2242_v61, %v1899_v62  ;;  %v2499_v0 = vpop.f32.mrb[45].mxu1 }
0x14fa   :  { %v1902_v1 = vpop.f32.mrb[46].mxu1  ;;  %v2257_v0 = vld [vmem:[%s3546_s18 + $0x1] ss:$0 sm:$0xff] }
0x14fb   :  { %v1908_v26 = vmul.f32 0.044715, %v1900_v63  ;;  %v1903_v3 = vadd.f32 %v2242_v61, %v1902_v1  ;;  %v2500_v4 = vpop.f32.mrb[47].mxu1  ;;  %v1906_v20 = vmul.f32 0.5, %v1900_v63 }
0x14fd   :  { %v1910_v5 = vmul.f32 %v1908_v26, %v1900_v63  ;;  %v1909_v6 = vmul.f32 0.044715, %v1903_v3  ;;  %v1907_v21 = vmul.f32 0.5, %v1903_v3 }
0x14ff   :  { %v1912_v24 = vmul.f32 %v1910_v5, %v1900_v63  ;;  %v1911_v7 = vmul.f32 %v1909_v6, %v1903_v3  ;;  %v2100_v6 = vld [vmem:[%s3549_s21] sm:$0xff] }
0x1501   :  { %v1914_v8 = vadd.f32 %v1912_v24, %v1900_v63  ;;  %v1913_v9 = vmul.f32 %v1911_v7, %v1903_v3  ;;  %v2101_v24 = vld [vmem:[%s3549_s21 + $0x8] sm:$0xff] }
0x1502   :  { %v2105_v7 = vpack.c.bf16 %v2101_v24, %v2100_v6 }
0x1503   :  { %v1916_v10 = vmul.f32 0.7978846, %v1914_v8  ;;  %v1915_v15 = vadd.f32 %v1913_v9, %v1903_v3  ;;  %v2102_v8 = vld [vmem:[%s3549_s21 + $0x10] sm:$0xff]  ;;  %v2103_v9 = vld [vmem:[%s3549_s21 + $0x18] sm:$0xff] }
0x1505   :  { %2667 = vtanh.f32 %v1916_v10  ;;  %v1917_v16 = vmul.f32 0.7978846, %v1915_v15  ;;  %v2106_v10 = vpack.c.bf16 %v2103_v9, %v2102_v8  ;;  %v2258_v15 = vld [vmem:[%s3548_s20] ss:$0 sm:$0xff]  ;;  %s2797_s20 = smov [#allocation8]  }
0x1506   :  { %s2176_s21 = sshll.u32 %s2797_s20, 4  ;;  %s2177_s21 = int_to_ptr.vmem [resolvable:$true] %s2176_s21 }
0x1507   :  { %2669 = vtanh.f32 %v1917_v16  ;;  %s2747_s29 = scalar_lea.vmem %s2177_s21, 32  ;;  %p2752_p11 = scmp.lt.s32.totalorder %s2177_s21, %s2177_s21 }
0x1508   :  { %p2748_p10 = scmp.ne.s32.totalorder %s2177_s21, %s2747_s29  ;;  %p2753_p12 = scmp.lt.s32.totalorder %s2747_s29, %s2747_s29 }
0x150a   :  { %p2754_p13 = por %p2753_p12, %p2752_p11 }
0x150c   :  { %p2755_p0 = pnand %p2754_p13, %p2748_p10 }
0x150f   :  { %v2668_v17 = vpop.eup %2667 }
0x1510   :  { %v1920_v18 = vadd.f32 1.0, %v2668_v17 }
0x1511   :  { %v2670_v19 = vpop.eup %2669 }
0x1512   :  { %v1921_v22 = vadd.f32 1.0, %v2670_v19  ;;  %v1922_v27 = vmul.f32 %v1920_v18, %v1906_v20 }
0x1514   :  { %v1923_v28 = vmul.f32 %v1921_v22, %v1907_v21  ;;  %v2260_v22 = vld [vmem:[%s3589_s9] ss:$0 sm:$0xff] }
0x1516   :  { %v1933_v38 = vpack.c.bf16 %v1923_v28, %v1922_v27 }
0x1518   :  { %2510 = vmatmul.mubr.msk.bf16.vlgmr.msra.gmra.mrb[48].mxu0 %vm1057_vm15, %v1933_v38 }
0x15eb   :  { %v1983_v11 = vpop.f32.mrb[48].mxu0 }
0x15ec   :  { %v1984_v12 = vadd.f32 %v2252_v29, %v1983_v11  ;;  %v2511_v42 = vpop.f32.mrb[49].mxu0 }
0x15ed   :  { %v1986_v30 = vpop.f32.mrb[50].mxu0 }
0x15ee   :  { %v1987_v31 = vadd.f32 %v2252_v29, %v1986_v30  ;;  %v2512_v32 = vpop.f32.mrb[51].mxu0  ;;  %v1990_v33 = vadd.f32 %v1984_v12, %v1844_v48  ;;  %v2043_v48 = vld [vmem:[%s3547_s19 + $0x8] sm:$0xff] }
0x15f0   :  { %v1996_v34 = vsel %vm202_vm11, %v1990_v33, 0.0  ;;  %v1991_v13 = vadd.f32 %v1987_v31, %v1845_v23  ;;  %v2047_v23 = vpack.c.bf16 %v2043_v48, %v2042_v47 }
0x15f1   :  { %1997 = vadd.xlane.f32.xlu0 %v1996_v34 }
0x15f2   :  { %v1999_v14 = vsel %vm202_vm11, %v1991_v13, 0.0  ;;  %2514 = vmatpush3.bf16.msra.mxu1 %v2047_v23 }
0x15f3   :  { %2000 = vadd.xlane.f32.xlu1 %v1999_v14  ;;  %2515 = vmatprep.subr.bf16.mxu1 %v2781_v2 }
0x15f6   :  { %2516 = vmatpush3.bf16.msra.mxu1 %v2048_v51 }
0x15f7   :  { %2521 = vmatprep.subr.bf16.mxu1 %v2781_v2 }
0x167e   :  { %v1998_v35 = vpop.xlane.xlu0 %1997 }
0x167f   :  { %v2002_v36 = vmul.f32 0.03125, %v1998_v35 }
0x1680   :  { %v2001_v37 = vpop.xlane.xlu1 %2000 }
0x1681   :  { %v2004_v39 = vsub.f32 %v1990_v33, %v2002_v36  ;;  %v2003_v40 = vmul.f32 0.03125, %v2001_v37 }
0x1683   :  { %v2005_v41 = vsub.f32 %v1991_v13, %v2003_v40  ;;  %v2006_v43 = vmul.f32 %v2004_v39, %v2004_v39 }
0x1685   :  { %v2008_v44 = vsel %vm202_vm11, %v2006_v43, 0.0  ;;  %v2007_v45 = vmul.f32 %v2005_v41, %v2005_v41 }
0x1686   :  { %2009 = vadd.xlane.f32.xlu0 %v2008_v44 }
0x1687   :  { %v2011_v46 = vsel %vm202_vm11, %v2007_v45, 0.0 }
0x1688   :  { %2012 = vadd.xlane.f32.xlu1 %v2011_v46 }
0x1713   :  { %v2010_v25 = vpop.xlane.xlu0 %2009 }
0x1714   :  { %v2014_v52 = vmul.f32 0.03125, %v2010_v25 }
0x1715   :  { %v2013_v53 = vpop.xlane.xlu1 %2012 }
0x1716   :  { %v2016_v54 = vadd.f32 1e-12, %v2014_v52  ;;  %v2015_v55 = vmul.f32 0.03125, %v2013_v53 }
0x1718   :  { %2671 = vrsqrt.f32 %v2016_v54  ;;  %v2017_v56 = vadd.f32 1e-12, %v2015_v55 }
0x171a   :  { %2673 = vrsqrt.f32 %v2017_v56 }
0x1722   :  { %v2672_v57 = vpop.eup %2671 }
0x1723   :  { %v2020_v58 = vmul.f32 %v2672_v57, %v2004_v39 }
0x1724   :  { %v2674_v59 = vpop.eup %2673 }
0x1725   :  { %v2021_v61 = vmul.f32 %v2674_v59, %v2005_v41  ;;  %v2028_v62 = vmul.f32 %v2256_v60, %v2020_v58 }
0x1727   :  { %v2029_v63 = vmul.f32 %v2256_v60, %v2021_v61  ;;  %v2036_v26 = vadd.f32 %v2257_v0, %v2028_v62 }
0x1729   :  { %v2037_v1 = vadd.f32 %v2257_v0, %v2029_v63 }
0x172b   :  { %v2039_v3 = vrot.slane %v2037_v1, 7 }
0x172d   :  { %v2041_v4 = vsel %vm148_vm7, %v2036_v26, %v2039_v3 }
0x172e   :  { %v2046_v5 = vpack.c.bf16 %v2041_v4, %v2041_v4 }
0x1730   :  { %2518 = vmatmul.mubr.msk.bf16.vlgmr.msra.gmra.mrb[48].mxu1 %vm202_vm11, %v2046_v5 }
0x1731   :  { %2525 = vmatprep.mubr.msk.bf16.mxu1 %vm2782_vm6, %v2781_v2  ;;  %2522 = vmatpush3.bf16.msra.mxu1 %v2105_v7 }
0x1732   :  { %2523 = vmatprep.subr.bf16.mxu1 %v2781_v2 }
0x1735   :  { %2524 = vmatpush3.bf16.msra.mxu1 %v2106_v10 }
0x1803   :  { %v2093_v16 = vpop.f32.mrb[48].mxu1 }
0x1804   :  { %v2094_v17 = vadd.f32 %v2258_v15, %v2093_v16  ;;  %v2519_v18 = vpop.f32.mrb[49].mxu1 }
0x1805   :  { %v2096_v19 = vpop.f32.mrb[50].mxu1 }
0x1806   :  { %2675 = vtanh.f32 %v2094_v17  ;;  %v2520_v2 = vpop.f32.mrb[51].mxu1 }
0x1810   :  { %v2676_v20 = vpop.eup %2675 }
0x1811   :  { %v2104_v21 = vpack.c.bf16 %v2676_v20, %v2676_v20 }
0x1813   :  { %2526 = vmatmul.mubr.msk.bf16.vlgmr.msra.gmra.mrb[52].mxu1 %vm202_vm11, %v2104_v21 }
0x18e6   :  { %v2151_v27 = vpop.f32.mrb[52].mxu1 }
0x18e7   :  { %v2152_v28 = vadd.f32 %v2260_v22, %v2151_v27  ;;  %v2527_v38 = vpop.f32.mrb[53].mxu1 }
0x18e8   :  { %v2154_v29 = vpop.f32.mrb[54].mxu1 }
0x18e9   :  { %v2528_v11 = vpop.f32.mrb[55].mxu1  ;;  %v2158_v12 = vsel %vm2157_vm0, %v2152_v28, -inf }
0x18ea   :  { %2159 = vmax.xlane.f32.xlu1 %v2158_v12 }
0x1977   :  { %v2160_v42 = vpop.xlane.xlu1 %2159 }
0x1978   :  { %v2161_v30 = vsub.f32 %v2152_v28, %v2160_v42 }
0x197a   :  { %v2162_v31 = vmul.f32 1.442695, %v2161_v30 }
0x197c   :  { %2677 = vpow2.f32 %v2162_v31 }
0x1986   :  { %v2678_v32 = vpop.eup %2677 }
0x1987   :  { %v2164_v33 = vsel %vm2157_vm0, %v2678_v32, 0.0 }
0x1988   :  { %2165 = vadd.xlane.f32.xlu0 %v2164_v33 }
0x1a15   :  { %v2166_v34 = vpop.xlane.xlu0 %2165 }
0x1a16   :  { %2679 = vrcp.f32 %v2166_v34 }
0x1a20   :  { %v2680_v13 = vpop.eup %2679 }
0x1a21   :  { %v2168_v14 = vmul.f32 %v2680_v13, %v2678_v32 }
0x1a23   :  { %2169 = vst.msk [vmem:[#allocation8] sm:$0x3] %vm2157_vm0, %v2168_v14 }
0x1a24   :  { %2758 = shalt.err (!%p2755_p0)
}
0x1a25   :  { %s3590_s26 = sld [smem:[#allocation21_spill]] }
0x1a2b   :  { %s2759_s15 = scalar_lea.hbm %s3590_s26, 32 }
0x1a2c   :  { %p2760_p1 = scmp.ne.s32.totalorder %s3590_s26, %s2759_s15  ;;  %p2763_p2 = scmp.lt.u32.totalorder %s2759_s15, %s3590_s26 }
0x1a2e   :  { %p2765_p3 = pnand %p2763_p2, %p2760_p1 }
0x1a30   :  { %2768 = shalt.err (!%p2765_p3)
}
0x1a31   :  { %2179 = dma.vmem_to_hbm [thread:$0]  %s2177_s21, 32, %s3590_s26, [#allocation4]  }
0x1a32   :  { %2773 = dma.done.wait [#allocation4], 32  }
0x1a33   :  { %2774 = vsyncadd [#allocation4], 4294967264 }
0x1a34   :  { %2183 = vsyncpa [#allocation3], 1 }
0x1a35   :  { %2184 = vsyncpa [#allocation6], 1 }
0x1a36   :  { %2185 = vsyncpa [#allocation4], 1 }

</bundles_post_ra>
